<compile_context>
chip_gen: v6e
topology: v6e:2x2x1
jax: 0.10.0
libtpu: 0.0.40
codegen_flags: <defaults>
</compile_context>

<pallas_src>
import math
import functools

import jax
import jax.numpy as jnp
from jax.experimental import pallas as pl
from jax.experimental.pallas import tpu as pltpu


def _mha_kernel(x_ref, wq_ref, bq_ref, wk_ref, bk_ref, wv_ref, bv_ref,
                wo_ref, bo_ref, *refs, causal, n_heads, emit_score):
    """One grid step = one batch element.

    x_ref     : (S, d_model)           f32   (cast to bf16 in-kernel)
    wq/wk_ref : (H, d_model, d_qk)     bf16  (wq already scaled by 1/sqrt(d_qk))
    wv_ref    : (H, d_model, d_v)      bf16
    wo_ref    : (H, d_v, d_model)      bf16
    bq/bk_ref : (H, 1, d_qk)           f32   (bq already scaled)
    bv_ref    : (H, 1, d_v)            f32
    bo_ref    : (1, d_model)           f32
    out_ref   : (S, d_model)           f32
    score_ref : (H, S, S)              score_dtype, raw (pre-mask/softmax) scores
    """
    if emit_score:
        out_ref, score_ref = refs
    else:
        (out_ref,) = refs
        score_ref = None

    x = x_ref[...].astype(jnp.bfloat16)                       # in-kernel cast (VPU)
    s_len, d_model = x.shape
    xb = jnp.broadcast_to(x[None], (n_heads, s_len, d_model))  # hoisted, built once

    # Head-batched projections: (H,S,d_model) x (H,d_model,d) -> (H,S,d), f32 acc.
    proj_dims = (((2,), (1,)), ((0,), (0,)))
    q = jax.lax.dot_general(xb, wq_ref[...], proj_dims,
                            preferred_element_type=jnp.float32) + bq_ref[...]
    k = jax.lax.dot_general(xb, wk_ref[...], proj_dims,
                            preferred_element_type=jnp.float32) + bk_ref[...]
    v = jax.lax.dot_general(xb, wv_ref[...], proj_dims,
                            preferred_element_type=jnp.float32) + bv_ref[...]
    q = q.astype(jnp.bfloat16)           # (H, S, d_qk) — 1/sqrt(d_qk) already folded in
    k = k.astype(jnp.bfloat16)           # (H, S, d_qk)
    v = v.astype(jnp.bfloat16)           # (H, S, d_v)

    # Scores for all heads at once, contracting the last dims (no transpose).
    s = jax.lax.dot_general(q, k, (((2,), (2,)), ((0,), (0,))),
                            preferred_element_type=jnp.float32)     # (H, S, S)

    if emit_score:
        # The module stores self.score BEFORE masking / softmax (but after the
        # 1/sqrt(d_qk) scaling, which is folded into q).  One lane-dense store.
        score_ref[...] = s.astype(score_ref.dtype)

    if causal:
        # Build the mask ONCE, broadcast over heads (no per-head iota/compare).
        row = jax.lax.broadcasted_iota(jnp.int32, (s_len, s_len), 0)
        col = jax.lax.broadcasted_iota(jnp.int32, (s_len, s_len), 1)
        s = jnp.where((row >= col)[None], s, jnp.float32(-2.0 ** 32 + 1))

    # Softmax vectorized over (H, S, :) — f32 elementwise, approx reciprocal on EUP.
    m = jnp.max(s, axis=-1, keepdims=True)
    p = jnp.exp(s - m)
    p = p * pl.reciprocal(jnp.sum(p, axis=-1, keepdims=True), approx=True)

    # P @ V, head-batched: (H,S,S) x (H,S,d_v) -> (H,S,d_v).
    attn = jax.lax.dot_general(p.astype(jnp.bfloat16), v,
                               (((2,), (1,)), ((0,), (0,))),
                               preferred_element_type=jnp.float32)

    # Output projection without concatenation: head-batched matmul against
    # (H, d_v, d_model) then a cheap sum over the head axis.
    out_h = jax.lax.dot_general(attn.astype(jnp.bfloat16), wo_ref[...],
                                (((2,), (1,)), ((0,), (0,))),
                                preferred_element_type=jnp.float32)  # (H,S,d_model)
    out = jnp.sum(out_h, axis=0) + bo_ref[...]
    out_ref[...] = out.astype(out_ref.dtype)


def _vmem_limit_bytes(S, d_model, d_qk, d_v, n_heads, score_bytes, weight_bufs):
    """Footprint-based VMEM budget, capped at ~85% of the chip's capacity."""
    bf, f4 = 2, 4
    weights = weight_bufs * n_heads * d_model * (2 * d_qk + 2 * d_v) * bf
    biases = weight_bufs * ((2 * n_heads * d_qk + n_heads * d_v + d_model) * f4)
    io = 2 * (2 * S * d_model * f4)                       # x + out blocks, 2-buffered
    if score_bytes:
        io += 2 * n_heads * S * S * score_bytes           # score block, 2-buffered
    interm = (n_heads * S * d_model * bf                  # broadcast x
              + n_heads * S * (2 * d_qk + d_v) * (f4 + bf)   # q, k, v (f32 + bf16)
              + n_heads * S * S * (2 * f4 + bf)           # s, p, p(bf16)
              + n_heads * S * d_v * f4                    # attn
              + n_heads * S * d_model * f4)               # per-head out
    need = weights + biases + io + interm
    try:
        cap = getattr(pltpu.get_tpu_info(), "vmem_capacity_bytes", None)
        if not cap:
            cap = 64 * 1024 * 1024
    except Exception:
        cap = 64 * 1024 * 1024                            # safe on every generation
    return int(min(max(int(need * 1.5), 32 * 1024 * 1024), int(cap * 0.85)))


def multi_head_attention(x, params, *, n_heads, d_qk, d_v, mask=False,
                         stage='eval', return_score=True,
                         score_dtype=jnp.bfloat16):
    """Returns (self_attention (B,S,d_model) f32, score (n_heads*B, S, S)) — same
    semantics as the PyTorch forward.  score is None if return_score=False; pass
    score_dtype=jnp.float32 for full-precision score storage (more HBM traffic)."""
    B, S, d_model = x.shape
    scale = jnp.float32(1.0 / math.sqrt(d_qk))

    wq_w, bq = params["wq_w"], params["bq"]      # (H*d_qk, d_model), (H*d_qk,)
    wk_w, bk = params["wk_w"], params["bk"]
    wv_w, bv = params["wv_w"], params["bv"]      # (H*d_v, d_model), (H*d_v,)
    wo_w, bo = params["wo_w"], params["bo"]      # (d_model, H*d_v), (d_model,)

    # Host-side (one-time) weight re-layout to head-batched form matching the
    # torch.chunk(dim=-1) head ordering; bf16 MXU inputs; fold 1/sqrt(d_qk) into Q.
    wq_r = (wq_w.T.reshape(d_model, n_heads, d_qk).transpose(1, 0, 2)
            * scale).astype(jnp.bfloat16)                            # (H, d_model, d_qk)
    bq_r = (bq.reshape(n_heads, 1, d_qk) * scale).astype(jnp.float32)
    wk_r = wk_w.T.reshape(d_model, n_heads, d_qk).transpose(1, 0, 2).astype(jnp.bfloat16)
    bk_r = bk.reshape(n_heads, 1, d_qk).astype(jnp.float32)
    wv_r = wv_w.T.reshape(d_model, n_heads, d_v).transpose(1, 0, 2).astype(jnp.bfloat16)
    bv_r = bv.reshape(n_heads, 1, d_v).astype(jnp.float32)
    wo_r = wo_w.T.reshape(n_heads, d_v, d_model).astype(jnp.bfloat16)  # (H, d_v, d_model)
    bo_r = bo.reshape(1, d_model).astype(jnp.float32)

    causal = bool(mask and stage == 'train')
    kernel = functools.partial(_mha_kernel, causal=causal, n_heads=n_heads,
                               emit_score=return_score)
    score_bytes = jnp.dtype(score_dtype).itemsize if return_score else 0

    def _call(buffered_weights):
        wkw = dict(pipeline_mode=pl.Buffered(1)) if buffered_weights else {}
        w3 = lambda b: (0, 0, 0)
        w2 = lambda b: (0, 0)
        in_specs = [
            pl.BlockSpec((None, S, d_model), lambda b: (b, 0, 0)),        # x (f32)
            pl.BlockSpec((n_heads, d_model, d_qk), w3, **wkw),            # wq (resident)
            pl.BlockSpec((n_heads, 1, d_qk), w3, **wkw),                  # bq
            pl.BlockSpec((n_heads, d_model, d_qk), w3, **wkw),            # wk
            pl.BlockSpec((n_heads, 1, d_qk), w3, **wkw),                  # bk
            pl.BlockSpec((n_heads, d_model, d_v), w3, **wkw),             # wv
            pl.BlockSpec((n_heads, 1, d_v), w3, **wkw),                   # bv
            pl.BlockSpec((n_heads, d_v, d_model), w3, **wkw),             # wo
            pl.BlockSpec((1, d_model), w2, **wkw),                        # bo
        ]
        out_shape = [jax.ShapeDtypeStruct((B, S, d_model), jnp.float32)]
        out_specs = [pl.BlockSpec((None, S, d_model), lambda b: (b, 0, 0))]
        if return_score:
            out_shape.append(jax.ShapeDtypeStruct((n_heads, B, S, S), score_dtype))
            out_specs.append(pl.BlockSpec((n_heads, None, S, S),
                                          lambda b: (0, b, 0, 0)))
        vmem = _vmem_limit_bytes(S, d_model, d_qk, d_v, n_heads, score_bytes,
                                 weight_bufs=1 if buffered_weights else 2)
        return pl.pallas_call(
            kernel,
            out_shape=tuple(out_shape),
            grid=(B,),
            in_specs=in_specs,
            out_specs=tuple(out_specs),
            compiler_params=pltpu.CompilerParams(
                dimension_semantics=("parallel",),
                vmem_limit_bytes=vmem),
        )(x, wq_r, bq_r, wk_r, bk_r, wv_r, bv_r, wo_r, bo_r)

    try:
        results = _call(True)
    except Exception:
        # Older jax without BlockSpec(pipeline_mode=...): fall back to the default
        # double-buffered weight specs (correct, slightly more resident VMEM).
        results = _call(False)

    if return_score:
        out, score = results
        # torch.cat(chunk(dim=-1), dim=0) ordering == head-major, batch-minor.
        return out, score.reshape(n_heads * B, S, S)
    return results[0], None


def _reference(x, params, *, n_heads, d_qk, d_v, mask=False, stage='eval'):
    """Pure-JAX (f32) transliteration of the PyTorch forward (for validation)."""
    wq_w, bq = params["wq_w"], params["bq"]
    wk_w, bk = params["wk_w"], params["bk"]
    wv_w, bv = params["wv_w"], params["bv"]
    wo_w, bo = params["wo_w"], params["bo"]

    Q = jnp.concatenate(jnp.split(x @ wq_w.T + bq, n_heads, axis=-1), axis=0)
    K = jnp.concatenate(jnp.split(x @ wk_w.T + bk, n_heads, axis=-1), axis=0)
    V = jnp.concatenate(jnp.split(x @ wv_w.T + bv, n_heads, axis=-1), axis=0)
    score = jnp.matmul(Q, K.transpose(0, 2, 1)) / math.sqrt(d_qk)
    raw = score
    if mask and stage == 'train':
        s = score.shape[-1]
        tril = jnp.tril(jnp.ones((s, s), jnp.float32))
        score = jnp.where(tril > 0, score, jnp.float32(-2.0 ** 32 + 1))
    p = jax.nn.softmax(score, axis=-1)
    attn = jnp.matmul(p, V)
    heads = jnp.concatenate(jnp.split(attn, n_heads, axis=0), axis=-1)
    out = heads @ wo_w.T + bo
    return out, raw


def _init_linear(key, out_features, in_features):
    """Deterministic init matching nn.Linear's uniform(-1/sqrt(in), 1/sqrt(in))."""
    kw, kb = jax.random.split(key)
    bound = 1.0 / math.sqrt(in_features)
    w = jax.random.uniform(kw, (out_features, in_features), jnp.float32, -bound, bound)
    b = jax.random.uniform(kb, (out_features,), jnp.float32, -bound, bound)
    return w, b


if __name__ == "__main__":
    B, S = 2, 8
    d_model, d_qk, d_v, n_heads = 32, 16, 16, 4

    key = jax.random.PRNGKey(0)
    kx, kq, kk, kv, ko = jax.random.split(key, 5)

    x = jax.random.normal(kx, (B, S, d_model), jnp.float32)
    wq_w, bq = _init_linear(kq, d_qk * n_heads, d_model)
    wk_w, bk = _init_linear(kk, d_qk * n_heads, d_model)
    wv_w, bv = _init_linear(kv, d_v * n_heads, d_model)
    wo_w, bo = _init_linear(ko, d_model, d_v * n_heads)
    params = dict(wq_w=wq_w, bq=bq, wk_w=wk_w, bk=bk,
                  wv_w=wv_w, bv=bv, wo_w=wo_w, bo=bo)

    # eval path (no causal mask)
    out, score = multi_head_attention(
        x, params, n_heads=n_heads, d_qk=d_qk, d_v=d_v, mask=False, stage='eval')
    out, score = jax.block_until_ready(out), jax.block_until_ready(score)
    ref_out, ref_score = _reference(
        x, params, n_heads=n_heads, d_qk=d_qk, d_v=d_v, mask=False, stage='eval')

    assert out.shape == (B, S, d_model)
    assert score.shape == (n_heads * B, S, S)
    # bf16 MXU inputs (f32 accumulate) and bf16 score storage -> compare against
    # the f32 reference with a bf16-appropriate tolerance.
    assert jnp.allclose(out, ref_out, atol=2e-2, rtol=2e-2)
    assert jnp.allclose(score.astype(jnp.float32), ref_score, atol=2e-2, rtol=2e-2)

    # train path with causal mask
    out_c, score_c = multi_head_attention(
        x, params, n_heads=n_heads, d_qk=d_qk, d_v=d_v, mask=True, stage='train')
    out_c, score_c = jax.block_until_ready(out_c), jax.block_until_ready(score_c)
    ref_out_c, ref_score_c = _reference(
        x, params, n_heads=n_heads, d_qk=d_qk, d_v=d_v, mask=True, stage='train')
    assert jnp.allclose(out_c, ref_out_c, atol=2e-2, rtol=2e-2)
    assert jnp.allclose(score_c.astype(jnp.float32), ref_score_c, atol=2e-2, rtol=2e-2)

    # no-score path (skips the dominant HBM writeback entirely)
    out_ns, none_score = multi_head_attention(
        x, params, n_heads=n_heads, d_qk=d_qk, d_v=d_v, mask=False, stage='eval',
        return_score=False)
    out_ns = jax.block_until_ready(out_ns)
    assert none_score is None
    assert jnp.allclose(out_ns, ref_out, atol=2e-2, rtol=2e-2)

    print("KERNEL_OK")
</pallas_src>

<mosaic_0001>
module attributes {stable_mosaic.version = 11 : i64} {
  func.func @_mha_kernel(%arg0: i32, %arg1: memref<1x8x32xf32, #tpu.memory_space<vmem>>, %arg2: memref<4x32x16xbf16, #tpu.memory_space<vmem>>, %arg3: memref<4x1x16xf32, #tpu.memory_space<vmem>>, %arg4: memref<4x32x16xbf16, #tpu.memory_space<vmem>>, %arg5: memref<4x1x16xf32, #tpu.memory_space<vmem>>, %arg6: memref<4x32x16xbf16, #tpu.memory_space<vmem>>, %arg7: memref<4x1x16xf32, #tpu.memory_space<vmem>>, %arg8: memref<4x16x32xbf16, #tpu.memory_space<vmem>>, %arg9: memref<1x32xf32, #tpu.memory_space<vmem>>, %arg10: memref<1x8x32xf32, #tpu.memory_space<vmem>>, %arg11: memref<4x1x8x8xbf16, #tpu.memory_space<vmem>>) attributes {dimension_semantics = [#tpu.dimension_semantics<parallel>], iteration_bounds = array<i64: 2>, scalar_prefetch = 0 : i64, scratch_operands = 0 : i64, tpu.core_type = #tpu.core_type<tc>, window_params = [{transform_indices = @transform_0, window_bounds = array<i64: 1, 8, 32>}, {pipeline_mode = #tpu.pipeline_mode<synchronous>, transform_indices = @transform_1, window_bounds = array<i64: 4, 32, 16>}, {pipeline_mode = #tpu.pipeline_mode<synchronous>, transform_indices = @transform_2, window_bounds = array<i64: 4, 1, 16>}, {pipeline_mode = #tpu.pipeline_mode<synchronous>, transform_indices = @transform_3, window_bounds = array<i64: 4, 32, 16>}, {pipeline_mode = #tpu.pipeline_mode<synchronous>, transform_indices = @transform_4, window_bounds = array<i64: 4, 1, 16>}, {pipeline_mode = #tpu.pipeline_mode<synchronous>, transform_indices = @transform_5, window_bounds = array<i64: 4, 32, 16>}, {pipeline_mode = #tpu.pipeline_mode<synchronous>, transform_indices = @transform_6, window_bounds = array<i64: 4, 1, 16>}, {pipeline_mode = #tpu.pipeline_mode<synchronous>, transform_indices = @transform_7, window_bounds = array<i64: 4, 16, 32>}, {pipeline_mode = #tpu.pipeline_mode<synchronous>, transform_indices = @transform_8, window_bounds = array<i64: 1, 32>}, {transform_indices = @transform_9, window_bounds = array<i64: 1, 8, 32>}, {transform_indices = @transform_10, window_bounds = array<i64: 4, 1, 8, 8>}]} {
    %c0 = arith.constant 0 : index
    %c0_0 = arith.constant 0 : index
    %c0_1 = arith.constant 0 : index
    %0 = vector.load %arg1[%c0, %c0_0, %c0_1] : memref<1x8x32xf32, #tpu.memory_space<vmem>>, vector<1x8x32xf32>
    %1 = vector.shape_cast %0 : vector<1x8x32xf32> to vector<8x32xf32>
    %2 = arith.truncf %1 : vector<8x32xf32> to vector<8x32xbf16>
    %3 = vector.shape_cast %2 : vector<8x32xbf16> to vector<1x8x32xbf16>
    %4 = vector.shape_cast %3 : vector<1x8x32xbf16> to vector<1x8x32xbf16>
    %5 = vector.broadcast %4 : vector<1x8x32xbf16> to vector<4x8x32xbf16>
    %c0_2 = arith.constant 0 : index
    %c0_3 = arith.constant 0 : index
    %c0_4 = arith.constant 0 : index
    %6 = vector.load %arg2[%c0_2, %c0_3, %c0_4] : memref<4x32x16xbf16, #tpu.memory_space<vmem>>, vector<4x32x16xbf16>
    %cst = arith.constant dense<0.000000e+00> : vector<4x8x16xf32>
    %7 = tpu.matmul %5, %6, %cst {dimension_numbers = #tpu.dot_dimension_numbers<[2], [1], [1], [2], [0, 0, 0, 1, 1, 2], [0], [0]>} : vector<4x8x32xbf16>, vector<4x32x16xbf16>, vector<4x8x16xf32> -> vector<4x8x16xf32>
    %c0_5 = arith.constant 0 : index
    %c0_6 = arith.constant 0 : index
    %c0_7 = arith.constant 0 : index
    %8 = vector.load %arg3[%c0_5, %c0_6, %c0_7] : memref<4x1x16xf32, #tpu.memory_space<vmem>>, vector<4x1x16xf32>
    %9 = vector.broadcast %8 : vector<4x1x16xf32> to vector<4x8x16xf32>
    %10 = arith.addf %7, %9 : vector<4x8x16xf32>
    %c0_8 = arith.constant 0 : index
    %c0_9 = arith.constant 0 : index
    %c0_10 = arith.constant 0 : index
    %11 = vector.load %arg4[%c0_8, %c0_9, %c0_10] : memref<4x32x16xbf16, #tpu.memory_space<vmem>>, vector<4x32x16xbf16>
    %cst_11 = arith.constant dense<0.000000e+00> : vector<4x8x16xf32>
    %12 = tpu.matmul %5, %11, %cst_11 {dimension_numbers = #tpu.dot_dimension_numbers<[2], [1], [1], [2], [0, 0, 0, 1, 1, 2], [0], [0]>} : vector<4x8x32xbf16>, vector<4x32x16xbf16>, vector<4x8x16xf32> -> vector<4x8x16xf32>
    %c0_12 = arith.constant 0 : index
    %c0_13 = arith.constant 0 : index
    %c0_14 = arith.constant 0 : index
    %13 = vector.load %arg5[%c0_12, %c0_13, %c0_14] : memref<4x1x16xf32, #tpu.memory_space<vmem>>, vector<4x1x16xf32>
    %14 = vector.broadcast %13 : vector<4x1x16xf32> to vector<4x8x16xf32>
    %15 = arith.addf %12, %14 : vector<4x8x16xf32>
    %c0_15 = arith.constant 0 : index
    %c0_16 = arith.constant 0 : index
    %c0_17 = arith.constant 0 : index
    %16 = vector.load %arg6[%c0_15, %c0_16, %c0_17] : memref<4x32x16xbf16, #tpu.memory_space<vmem>>, vector<4x32x16xbf16>
    %cst_18 = arith.constant dense<0.000000e+00> : vector<4x8x16xf32>
    %17 = tpu.matmul %5, %16, %cst_18 {dimension_numbers = #tpu.dot_dimension_numbers<[2], [1], [1], [2], [0, 0, 0, 1, 1, 2], [0], [0]>} : vector<4x8x32xbf16>, vector<4x32x16xbf16>, vector<4x8x16xf32> -> vector<4x8x16xf32>
    %c0_19 = arith.constant 0 : index
    %c0_20 = arith.constant 0 : index
    %c0_21 = arith.constant 0 : index
    %18 = vector.load %arg7[%c0_19, %c0_20, %c0_21] : memref<4x1x16xf32, #tpu.memory_space<vmem>>, vector<4x1x16xf32>
    %19 = vector.broadcast %18 : vector<4x1x16xf32> to vector<4x8x16xf32>
    %20 = arith.addf %17, %19 : vector<4x8x16xf32>
    %21 = arith.truncf %10 : vector<4x8x16xf32> to vector<4x8x16xbf16>
    %22 = arith.truncf %15 : vector<4x8x16xf32> to vector<4x8x16xbf16>
    %23 = arith.truncf %20 : vector<4x8x16xf32> to vector<4x8x16xbf16>
    %cst_22 = arith.constant dense<0.000000e+00> : vector<4x8x8xf32>
    %24 = tpu.matmul %21, %22, %cst_22 {dimension_numbers = #tpu.dot_dimension_numbers<[2], [2], [1], [1], [0, 0, 0, 1, 1, 1], [0], [0]>} : vector<4x8x16xbf16>, vector<4x8x16xbf16>, vector<4x8x8xf32> -> vector<4x8x8xf32>
    %25 = arith.truncf %24 : vector<4x8x8xf32> to vector<4x8x8xbf16>
    %c0_23 = arith.constant 0 : index
    %c0_24 = arith.constant 0 : index
    %c0_25 = arith.constant 0 : index
    %c0_26 = arith.constant 0 : index
    %26 = vector.load %arg11[%c0_23, %c0_24, %c0_25, %c0_26] : memref<4x1x8x8xbf16, #tpu.memory_space<vmem>>, vector<4x1x8x8xbf16>
    %27 = vector.shape_cast %26 : vector<4x1x8x8xbf16> to vector<4x8x8xbf16>
    %28 = vector.shape_cast %25 : vector<4x8x8xbf16> to vector<4x1x8x8xbf16>
    tpu.vector_store %arg11[%c0_23, %c0_24, %c0_25, %c0_26], %28 {strides = array<i32>} : memref<4x1x8x8xbf16, #tpu.memory_space<vmem>>, vector<4x1x8x8xbf16>,
    %cst_27 = arith.constant dense<0xFF800000> : vector<4x8xf32>
    %29 = vector.multi_reduction <maximumf>, %24, %cst_27 [2] : vector<4x8x8xf32> to vector<4x8xf32>
    %30 = vector.shape_cast %29 : vector<4x8xf32> to vector<4x8x1xf32>
    %31 = vector.broadcast %30 : vector<4x8x1xf32> to vector<4x8x8xf32>
    %32 = arith.subf %24, %31 : vector<4x8x8xf32>
    %33 = math.exp %32 : vector<4x8x8xf32>
    %cst_28 = arith.constant dense<0.000000e+00> : vector<4x8xf32>
    %34 = vector.multi_reduction <add>, %33, %cst_28 [2] : vector<4x8x8xf32> to vector<4x8xf32>
    %35 = vector.shape_cast %34 : vector<4x8xf32> to vector<4x8x1xf32>
    %36 = tpu.reciprocal %35 {approx = true} : vector<4x8x1xf32> -> vector<4x8x1xf32>
    %37 = vector.broadcast %36 : vector<4x8x1xf32> to vector<4x8x8xf32>
    %38 = arith.mulf %33, %37 : vector<4x8x8xf32>
    %39 = arith.truncf %38 : vector<4x8x8xf32> to vector<4x8x8xbf16>
    %cst_29 = arith.constant dense<0.000000e+00> : vector<4x8x16xf32>
    %40 = tpu.matmul %39, %23, %cst_29 {dimension_numbers = #tpu.dot_dimension_numbers<[2], [1], [1], [2], [0, 0, 0, 1, 1, 2], [0], [0]>} : vector<4x8x8xbf16>, vector<4x8x16xbf16>, vector<4x8x16xf32> -> vector<4x8x16xf32>
    %41 = arith.truncf %40 : vector<4x8x16xf32> to vector<4x8x16xbf16>
    %c0_30 = arith.constant 0 : index
    %c0_31 = arith.constant 0 : index
    %c0_32 = arith.constant 0 : index
    %42 = vector.load %arg8[%c0_30, %c0_31, %c0_32] : memref<4x16x32xbf16, #tpu.memory_space<vmem>>, vector<4x16x32xbf16>
    %cst_33 = arith.constant dense<0.000000e+00> : vector<4x8x32xf32>
    %43 = tpu.matmul %41, %42, %cst_33 {dimension_numbers = #tpu.dot_dimension_numbers<[2], [1], [1], [2], [0, 0, 0, 1, 1, 2], [0], [0]>} : vector<4x8x16xbf16>, vector<4x16x32xbf16>, vector<4x8x32xf32> -> vector<4x8x32xf32>
    %cst_34 = arith.constant dense<0.000000e+00> : vector<8x32xf32>
    %44 = vector.multi_reduction <add>, %43, %cst_34 [0] : vector<4x8x32xf32> to vector<8x32xf32>
    %c0_35 = arith.constant 0 : index
    %c0_36 = arith.constant 0 : index
    %45 = vector.load %arg9[%c0_35, %c0_36] : memref<1x32xf32, #tpu.memory_space<vmem>>, vector<1x32xf32>
    %46 = vector.broadcast %45 : vector<1x32xf32> to vector<8x32xf32>
    %47 = arith.addf %44, %46 : vector<8x32xf32>
    %c0_37 = arith.constant 0 : index
    %c0_38 = arith.constant 0 : index
    %c0_39 = arith.constant 0 : index
    %48 = vector.load %arg10[%c0_37, %c0_38, %c0_39] : memref<1x8x32xf32, #tpu.memory_space<vmem>>, vector<1x8x32xf32>
    %49 = vector.shape_cast %48 : vector<1x8x32xf32> to vector<8x32xf32>
    %50 = vector.shape_cast %47 : vector<8x32xf32> to vector<1x8x32xf32>
    tpu.vector_store %arg10[%c0_37, %c0_38, %c0_39], %50 {strides = array<i32>} : memref<1x8x32xf32, #tpu.memory_space<vmem>>, vector<1x8x32xf32>,
    return
  }
  func.func @transform_0(%arg0: i32) -> (i32, i32, i32) {
    %c0_i32 = arith.constant 0 : i32
    %c0_i32_0 = arith.constant 0 : i32
    %c0_i32_1 = arith.constant 0 : i32
    return %arg0, %c0_i32, %c0_i32_0 : i32, i32, i32
  }
  func.func @transform_1(%arg0: i32) -> (i32, i32, i32) {
    %c0_i32 = arith.constant 0 : i32
    %c0_i32_0 = arith.constant 0 : i32
    %c0_i32_1 = arith.constant 0 : i32
    %c0_i32_2 = arith.constant 0 : i32
    return %c0_i32, %c0_i32_0, %c0_i32_1 : i32, i32, i32
  }
  func.func @transform_2(%arg0: i32) -> (i32, i32, i32) {
    %c0_i32 = arith.constant 0 : i32
    %c0_i32_0 = arith.constant 0 : i32
    %c0_i32_1 = arith.constant 0 : i32
    %c0_i32_2 = arith.constant 0 : i32
    return %c0_i32, %c0_i32_0, %c0_i32_1 : i32, i32, i32
  }
  func.func @transform_3(%arg0: i32) -> (i32, i32, i32) {
    %c0_i32 = arith.constant 0 : i32
    %c0_i32_0 = arith.constant 0 : i32
    %c0_i32_1 = arith.constant 0 : i32
    %c0_i32_2 = arith.constant 0 : i32
    return %c0_i32, %c0_i32_0, %c0_i32_1 : i32, i32, i32
  }
  func.func @transform_4(%arg0: i32) -> (i32, i32, i32) {
    %c0_i32 = arith.constant 0 : i32
    %c0_i32_0 = arith.constant 0 : i32
    %c0_i32_1 = arith.constant 0 : i32
    %c0_i32_2 = arith.constant 0 : i32
    return %c0_i32, %c0_i32_0, %c0_i32_1 : i32, i32, i32
  }
  func.func @transform_5(%arg0: i32) -> (i32, i32, i32) {
    %c0_i32 = arith.constant 0 : i32
    %c0_i32_0 = arith.constant 0 : i32
    %c0_i32_1 = arith.constant 0 : i32
    %c0_i32_2 = arith.constant 0 : i32
    return %c0_i32, %c0_i32_0, %c0_i32_1 : i32, i32, i32
  }
  func.func @transform_6(%arg0: i32) -> (i32, i32, i32) {
    %c0_i32 = arith.constant 0 : i32
    %c0_i32_0 = arith.constant 0 : i32
    %c0_i32_1 = arith.constant 0 : i32
    %c0_i32_2 = arith.constant 0 : i32
    return %c0_i32, %c0_i32_0, %c0_i32_1 : i32, i32, i32
  }
  func.func @transform_7(%arg0: i32) -> (i32, i32, i32) {
    %c0_i32 = arith.constant 0 : i32
    %c0_i32_0 = arith.constant 0 : i32
    %c0_i32_1 = arith.constant 0 : i32
    %c0_i32_2 = arith.constant 0 : i32
    return %c0_i32, %c0_i32_0, %c0_i32_1 : i32, i32, i32
  }
  func.func @transform_8(%arg0: i32) -> (i32, i32) {
    %c0_i32 = arith.constant 0 : i32
    %c0_i32_0 = arith.constant 0 : i32
    %c0_i32_1 = arith.constant 0 : i32
    return %c0_i32, %c0_i32_0 : i32, i32
  }
  func.func @transform_9(%arg0: i32) -> (i32, i32, i32) {
    %c0_i32 = arith.constant 0 : i32
    %c0_i32_0 = arith.constant 0 : i32
    %c0_i32_1 = arith.constant 0 : i32
    return %arg0, %c0_i32, %c0_i32_0 : i32, i32, i32
  }
  func.func @transform_10(%arg0: i32) -> (i32, i32, i32, i32) {
    %c0_i32 = arith.constant 0 : i32
    %c0_i32_0 = arith.constant 0 : i32
    %c0_i32_1 = arith.constant 0 : i32
    %c0_i32_2 = arith.constant 0 : i32
    return %c0_i32, %arg0, %c0_i32_0, %c0_i32_1 : i32, i32, i32, i32
  }
}

module attributes {stable_mosaic.version = 11 : i64} {
  func.func @_mha_kernel(%arg0: i32, %arg1: memref<1x8x32xf32, #tpu.memory_space<vmem>>, %arg2: memref<4x32x16xbf16, #tpu.memory_space<vmem>>, %arg3: memref<4x1x16xf32, #tpu.memory_space<vmem>>, %arg4: memref<4x32x16xbf16, #tpu.memory_space<vmem>>, %arg5: memref<4x1x16xf32, #tpu.memory_space<vmem>>, %arg6: memref<4x32x16xbf16, #tpu.memory_space<vmem>>, %arg7: memref<4x1x16xf32, #tpu.memory_space<vmem>>, %arg8: memref<4x16x32xbf16, #tpu.memory_space<vmem>>, %arg9: memref<1x32xf32, #tpu.memory_space<vmem>>, %arg10: memref<1x8x32xf32, #tpu.memory_space<vmem>>, %arg11: memref<4x1x8x8xbf16, #tpu.memory_space<vmem>>) attributes {dimension_semantics = [#tpu.dimension_semantics<parallel>], iteration_bounds = array<i64: 2>, scalar_prefetch = 0 : i64, scratch_operands = 0 : i64, tpu.core_type = #tpu.core_type<tc>, window_params = [{transform_indices = @transform_0, window_bounds = array<i64: 1, 8, 32>}, {pipeline_mode = #tpu.pipeline_mode<synchronous>, transform_indices = @transform_1, window_bounds = array<i64: 4, 32, 16>}, {pipeline_mode = #tpu.pipeline_mode<synchronous>, transform_indices = @transform_2, window_bounds = array<i64: 4, 1, 16>}, {pipeline_mode = #tpu.pipeline_mode<synchronous>, transform_indices = @transform_3, window_bounds = array<i64: 4, 32, 16>}, {pipeline_mode = #tpu.pipeline_mode<synchronous>, transform_indices = @transform_4, window_bounds = array<i64: 4, 1, 16>}, {pipeline_mode = #tpu.pipeline_mode<synchronous>, transform_indices = @transform_5, window_bounds = array<i64: 4, 32, 16>}, {pipeline_mode = #tpu.pipeline_mode<synchronous>, transform_indices = @transform_6, window_bounds = array<i64: 4, 1, 16>}, {pipeline_mode = #tpu.pipeline_mode<synchronous>, transform_indices = @transform_7, window_bounds = array<i64: 4, 16, 32>}, {pipeline_mode = #tpu.pipeline_mode<synchronous>, transform_indices = @transform_8, window_bounds = array<i64: 1, 32>}, {transform_indices = @transform_9, window_bounds = array<i64: 1, 8, 32>}, {transform_indices = @transform_10, window_bounds = array<i64: 4, 1, 8, 8>}]} {
    %c0 = arith.constant 0 : index
    %c0_0 = arith.constant 0 : index
    %c0_1 = arith.constant 0 : index
    %0 = vector.load %arg1[%c0, %c0_0, %c0_1] : memref<1x8x32xf32, #tpu.memory_space<vmem>>, vector<1x8x32xf32>
    %1 = vector.shape_cast %0 : vector<1x8x32xf32> to vector<8x32xf32>
    %2 = arith.truncf %1 : vector<8x32xf32> to vector<8x32xbf16>
    %3 = vector.shape_cast %2 : vector<8x32xbf16> to vector<1x8x32xbf16>
    %4 = vector.shape_cast %3 : vector<1x8x32xbf16> to vector<1x8x32xbf16>
    %5 = vector.broadcast %4 : vector<1x8x32xbf16> to vector<4x8x32xbf16>
    %c0_2 = arith.constant 0 : index
    %c0_3 = arith.constant 0 : index
    %c0_4 = arith.constant 0 : index
    %6 = vector.load %arg2[%c0_2, %c0_3, %c0_4] : memref<4x32x16xbf16, #tpu.memory_space<vmem>>, vector<4x32x16xbf16>
    %cst = arith.constant dense<0.000000e+00> : vector<4x8x16xf32>
    %7 = tpu.matmul %5, %6, %cst {dimension_numbers = #tpu.dot_dimension_numbers<[2], [1], [1], [2], [0, 0, 0, 1, 1, 2], [0], [0]>} : vector<4x8x32xbf16>, vector<4x32x16xbf16>, vector<4x8x16xf32> -> vector<4x8x16xf32>
    %c0_5 = arith.constant 0 : index
    %c0_6 = arith.constant 0 : index
    %c0_7 = arith.constant 0 : index
    %8 = vector.load %arg3[%c0_5, %c0_6, %c0_7] : memref<4x1x16xf32, #tpu.memory_space<vmem>>, vector<4x1x16xf32>
    %9 = vector.broadcast %8 : vector<4x1x16xf32> to vector<4x8x16xf32>
    %10 = arith.addf %7, %9 : vector<4x8x16xf32>
    %c0_8 = arith.constant 0 : index
    %c0_9 = arith.constant 0 : index
    %c0_10 = arith.constant 0 : index
    %11 = vector.load %arg4[%c0_8, %c0_9, %c0_10] : memref<4x32x16xbf16, #tpu.memory_space<vmem>>, vector<4x32x16xbf16>
    %cst_11 = arith.constant dense<0.000000e+00> : vector<4x8x16xf32>
    %12 = tpu.matmul %5, %11, %cst_11 {dimension_numbers = #tpu.dot_dimension_numbers<[2], [1], [1], [2], [0, 0, 0, 1, 1, 2], [0], [0]>} : vector<4x8x32xbf16>, vector<4x32x16xbf16>, vector<4x8x16xf32> -> vector<4x8x16xf32>
    %c0_12 = arith.constant 0 : index
    %c0_13 = arith.constant 0 : index
    %c0_14 = arith.constant 0 : index
    %13 = vector.load %arg5[%c0_12, %c0_13, %c0_14] : memref<4x1x16xf32, #tpu.memory_space<vmem>>, vector<4x1x16xf32>
    %14 = vector.broadcast %13 : vector<4x1x16xf32> to vector<4x8x16xf32>
    %15 = arith.addf %12, %14 : vector<4x8x16xf32>
    %c0_15 = arith.constant 0 : index
    %c0_16 = arith.constant 0 : index
    %c0_17 = arith.constant 0 : index
    %16 = vector.load %arg6[%c0_15, %c0_16, %c0_17] : memref<4x32x16xbf16, #tpu.memory_space<vmem>>, vector<4x32x16xbf16>
    %cst_18 = arith.constant dense<0.000000e+00> : vector<4x8x16xf32>
    %17 = tpu.matmul %5, %16, %cst_18 {dimension_numbers = #tpu.dot_dimension_numbers<[2], [1], [1], [2], [0, 0, 0, 1, 1, 2], [0], [0]>} : vector<4x8x32xbf16>, vector<4x32x16xbf16>, vector<4x8x16xf32> -> vector<4x8x16xf32>
    %c0_19 = arith.constant 0 : index
    %c0_20 = arith.constant 0 : index
    %c0_21 = arith.constant 0 : index
    %18 = vector.load %arg7[%c0_19, %c0_20, %c0_21] : memref<4x1x16xf32, #tpu.memory_space<vmem>>, vector<4x1x16xf32>
    %19 = vector.broadcast %18 : vector<4x1x16xf32> to vector<4x8x16xf32>
    %20 = arith.addf %17, %19 : vector<4x8x16xf32>
    %21 = arith.truncf %10 : vector<4x8x16xf32> to vector<4x8x16xbf16>
    %22 = arith.truncf %15 : vector<4x8x16xf32> to vector<4x8x16xbf16>
    %23 = arith.truncf %20 : vector<4x8x16xf32> to vector<4x8x16xbf16>
    %cst_22 = arith.constant dense<0.000000e+00> : vector<4x8x8xf32>
    %24 = tpu.matmul %21, %22, %cst_22 {dimension_numbers = #tpu.dot_dimension_numbers<[2], [2], [1], [1], [0, 0, 0, 1, 1, 1], [0], [0]>} : vector<4x8x16xbf16>, vector<4x8x16xbf16>, vector<4x8x8xf32> -> vector<4x8x8xf32>
    %25 = arith.truncf %24 : vector<4x8x8xf32> to vector<4x8x8xbf16>
    %c0_23 = arith.constant 0 : index
    %c0_24 = arith.constant 0 : index
    %c0_25 = arith.constant 0 : index
    %c0_26 = arith.constant 0 : index
    %26 = vector.load %arg11[%c0_23, %c0_24, %c0_25, %c0_26] : memref<4x1x8x8xbf16, #tpu.memory_space<vmem>>, vector<4x1x8x8xbf16>
    %27 = vector.shape_cast %26 : vector<4x1x8x8xbf16> to vector<4x8x8xbf16>
    %28 = vector.shape_cast %25 : vector<4x8x8xbf16> to vector<4x1x8x8xbf16>
    tpu.vector_store %arg11[%c0_23, %c0_24, %c0_25, %c0_26], %28 {strides = array<i32>} : memref<4x1x8x8xbf16, #tpu.memory_space<vmem>>, vector<4x1x8x8xbf16>,
    %cst_27 = arith.constant dense<0xFF800000> : vector<4x8xf32>
    %29 = vector.multi_reduction <maximumf>, %24, %cst_27 [2] : vector<4x8x8xf32> to vector<4x8xf32>
    %30 = vector.shape_cast %29 : vector<4x8xf32> to vector<4x8x1xf32>
    %31 = vector.broadcast %30 : vector<4x8x1xf32> to vector<4x8x8xf32>
    %32 = arith.subf %24, %31 : vector<4x8x8xf32>
    %33 = math.exp %32 : vector<4x8x8xf32>
    %cst_28 = arith.constant dense<0.000000e+00> : vector<4x8xf32>
    %34 = vector.multi_reduction <add>, %33, %cst_28 [2] : vector<4x8x8xf32> to vector<4x8xf32>
    %35 = vector.shape_cast %34 : vector<4x8xf32> to vector<4x8x1xf32>
    %36 = tpu.reciprocal %35 {approx = true} : vector<4x8x1xf32> -> vector<4x8x1xf32>
    %37 = vector.broadcast %36 : vector<4x8x1xf32> to vector<4x8x8xf32>
    %38 = arith.mulf %33, %37 : vector<4x8x8xf32>
    %39 = arith.truncf %38 : vector<4x8x8xf32> to vector<4x8x8xbf16>
    %cst_29 = arith.constant dense<0.000000e+00> : vector<4x8x16xf32>
    %40 = tpu.matmul %39, %23, %cst_29 {dimension_numbers = #tpu.dot_dimension_numbers<[2], [1], [1], [2], [0, 0, 0, 1, 1, 2], [0], [0]>} : vector<4x8x8xbf16>, vector<4x8x16xbf16>, vector<4x8x16xf32> -> vector<4x8x16xf32>
    %41 = arith.truncf %40 : vector<4x8x16xf32> to vector<4x8x16xbf16>
    %c0_30 = arith.constant 0 : index
    %c0_31 = arith.constant 0 : index
    %c0_32 = arith.constant 0 : index
    %42 = vector.load %arg8[%c0_30, %c0_31, %c0_32] : memref<4x16x32xbf16, #tpu.memory_space<vmem>>, vector<4x16x32xbf16>
    %cst_33 = arith.constant dense<0.000000e+00> : vector<4x8x32xf32>
    %43 = tpu.matmul %41, %42, %cst_33 {dimension_numbers = #tpu.dot_dimension_numbers<[2], [1], [1], [2], [0, 0, 0, 1, 1, 2], [0], [0]>} : vector<4x8x16xbf16>, vector<4x16x32xbf16>, vector<4x8x32xf32> -> vector<4x8x32xf32>
    %cst_34 = arith.constant dense<0.000000e+00> : vector<8x32xf32>
    %44 = vector.multi_reduction <add>, %43, %cst_34 [0] : vector<4x8x32xf32> to vector<8x32xf32>
    %c0_35 = arith.constant 0 : index
    %c0_36 = arith.constant 0 : index
    %45 = vector.load %arg9[%c0_35, %c0_36] : memref<1x32xf32, #tpu.memory_space<vmem>>, vector<1x32xf32>
    %46 = vector.broadcast %45 : vector<1x32xf32> to vector<8x32xf32>
    %47 = arith.addf %44, %46 : vector<8x32xf32>
    %c0_37 = arith.constant 0 : index
    %c0_38 = arith.constant 0 : index
    %c0_39 = arith.constant 0 : index
    %48 = vector.load %arg10[%c0_37, %c0_38, %c0_39] : memref<1x8x32xf32, #tpu.memory_space<vmem>>, vector<1x8x32xf32>
    %49 = vector.shape_cast %48 : vector<1x8x32xf32> to vector<8x32xf32>
    %50 = vector.shape_cast %47 : vector<8x32xf32> to vector<1x8x32xf32>
    tpu.vector_store %arg10[%c0_37, %c0_38, %c0_39], %50 {strides = array<i32>} : memref<1x8x32xf32, #tpu.memory_space<vmem>>, vector<1x8x32xf32>,
    return
  }
  func.func @transform_0(%arg0: i32) -> (i32, i32, i32) {
    %c0_i32 = arith.constant 0 : i32
    %c0_i32_0 = arith.constant 0 : i32
    %c0_i32_1 = arith.constant 0 : i32
    return %arg0, %c0_i32, %c0_i32_0 : i32, i32, i32
  }
  func.func @transform_1(%arg0: i32) -> (i32, i32, i32) {
    %c0_i32 = arith.constant 0 : i32
    %c0_i32_0 = arith.constant 0 : i32
    %c0_i32_1 = arith.constant 0 : i32
    %c0_i32_2 = arith.constant 0 : i32
    return %c0_i32, %c0_i32_0, %c0_i32_1 : i32, i32, i32
  }
  func.func @transform_2(%arg0: i32) -> (i32, i32, i32) {
    %c0_i32 = arith.constant 0 : i32
    %c0_i32_0 = arith.constant 0 : i32
    %c0_i32_1 = arith.constant 0 : i32
    %c0_i32_2 = arith.constant 0 : i32
    return %c0_i32, %c0_i32_0, %c0_i32_1 : i32, i32, i32
  }
  func.func @transform_3(%arg0: i32) -> (i32, i32, i32) {
    %c0_i32 = arith.constant 0 : i32
    %c0_i32_0 = arith.constant 0 : i32
    %c0_i32_1 = arith.constant 0 : i32
    %c0_i32_2 = arith.constant 0 : i32
    return %c0_i32, %c0_i32_0, %c0_i32_1 : i32, i32, i32
  }
  func.func @transform_4(%arg0: i32) -> (i32, i32, i32) {
    %c0_i32 = arith.constant 0 : i32
    %c0_i32_0 = arith.constant 0 : i32
    %c0_i32_1 = arith.constant 0 : i32
    %c0_i32_2 = arith.constant 0 : i32
    return %c0_i32, %c0_i32_0, %c0_i32_1 : i32, i32, i32
  }
  func.func @transform_5(%arg0: i32) -> (i32, i32, i32) {
    %c0_i32 = arith.constant 0 : i32
    %c0_i32_0 = arith.constant 0 : i32
    %c0_i32_1 = arith.constant 0 : i32
    %c0_i32_2 = arith.constant 0 : i32
    return %c0_i32, %c0_i32_0, %c0_i32_1 : i32, i32, i32
  }
  func.func @transform_6(%arg0: i32) -> (i32, i32, i32) {
    %c0_i32 = arith.constant 0 : i32
    %c0_i32_0 = arith.constant 0 : i32
    %c0_i32_1 = arith.constant 0 : i32
    %c0_i32_2 = arith.constant 0 : i32
    return %c0_i32, %c0_i32_0, %c0_i32_1 : i32, i32, i32
  }
  func.func @transform_7(%arg0: i32) -> (i32, i32, i32) {
    %c0_i32 = arith.constant 0 : i32
    %c0_i32_0 = arith.constant 0 : i32
    %c0_i32_1 = arith.constant 0 : i32
    %c0_i32_2 = arith.constant 0 : i32
    return %c0_i32, %c0_i32_0, %c0_i32_1 : i32, i32, i32
  }
  func.func @transform_8(%arg0: i32) -> (i32, i32) {
    %c0_i32 = arith.constant 0 : i32
    %c0_i32_0 = arith.constant 0 : i32
    %c0_i32_1 = arith.constant 0 : i32
    return %c0_i32, %c0_i32_0 : i32, i32
  }
  func.func @transform_9(%arg0: i32) -> (i32, i32, i32) {
    %c0_i32 = arith.constant 0 : i32
    %c0_i32_0 = arith.constant 0 : i32
    %c0_i32_1 = arith.constant 0 : i32
    return %arg0, %c0_i32, %c0_i32_0 : i32, i32, i32
  }
  func.func @transform_10(%arg0: i32) -> (i32, i32, i32, i32) {
    %c0_i32 = arith.constant 0 : i32
    %c0_i32_0 = arith.constant 0 : i32
    %c0_i32_1 = arith.constant 0 : i32
    %c0_i32_2 = arith.constant 0 : i32
    return %c0_i32, %arg0, %c0_i32_0, %c0_i32_1 : i32, i32, i32, i32
  }
}

</mosaic_0001>

<bundles_post_ra>
// kernel: tpu_custom_call.1
= control target key start
LH: loop header
LB: loop body
LE: loop exit
PB: predicated region body
PF: predicated region fallthrough
CT: control target
= control target key end

     0   :  { %s2883_s0 = inlined_call_operand.vmem [shape: f32[2,8,32], index: 0, kind: input, shape index: {}]   ;;  %s2884_s1 = inlined_call_operand.vmem [shape: bf16[4,32,16], index: 1, kind: input, shape index: {}]   ;;  %s2885_s2 = inlined_call_operand.vmem [shape: f32[4,1,16], index: 2, kind: input, shape index: {}]   ;;  %s2886_s3 = inlined_call_operand.vmem [shape: bf16[4,32,16], index: 3, kind: input, shape index: {}]   ;;  %s2887_s4 = inlined_call_operand.vmem [shape: f32[4,1,16], index: 4, kind: input, shape index: {}]   ;;  %s2888_s5 = inlined_call_operand.vmem [shape: bf16[4,32,16], index: 5, kind: input, shape index: {}]   ;;  %s2889_s6 = inlined_call_operand.vmem [shape: f32[4,1,16], index: 6, kind: input, shape index: {}]   ;;  %s2890_s7 = inlined_call_operand.vmem [shape: bf16[4,16,32], index: 7, kind: input, shape index: {}]   ;;  %s2891_s8 = inlined_call_operand.vmem [shape: f32[1,32], index: 8, kind: input, shape index: {}]   ;;  %s2892_s9 = inlined_call_operand.hbm [shape: f32[2,8,32], index: 9, kind: output, shape index: {0}]   ;;  %s2893_s10 = inlined_call_operand.hbm [shape: bf16[4,2,8,8], index: 10, kind: output, shape index: {1}]  }
   0x1   :  { %2894 = sst [smem:[#allocation8_spill]] %s2883_s0 }
   0x2   :  { %2895 = sst [smem:[#allocation9_spill]] %s2884_s1 }
   0x3   :  { %16 = vsyncpa [#allocation3], 0 }
   0x4   :  { %18 = vsyncpa [#allocation3 + $0x1], 0 }
   0x5   :  { %19 = vsyncpa [#allocation5], 0 }
   0x6   :  { %21 = vsyncpa [#allocation5 + $0x1], 0  ;;  %s2471_s13 = smov 0   ;;  %s2473_s14 = smov 0  }
   0x7   :  { %s2475_s15 = smov 0   ;;  %s2477_s16 = smov 0  }
   0x8 LB: > { %s2492_s17 = sadd.s32 4294967295, %s2407_s16   ;;  %s1918_s18 = sadd.s32 4294967294, %s2407_s16   ;;  %s2407_s16 = sphi %s2477_s16, %s2904_s16   ;;  %s2403_s15 = sphi %s2475_s15, %s2903_s15   ;;  %s2399_s14 = sphi %s2473_s14, %s2902_s14   ;;  %s2395_s13 = sphi %s2471_s13, %s2901_s13  }
   0x9   : > { %s2496_s19 = sadd.s32 1, %s2407_s16   ;;  %s228_s20 = sadd.s32 1, %s2403_s15 }
   0xa   : > { %s225_s21 = ssub.s32 %s2407_s16, %s2496_s19  ;;  %p238_p0 = scmp.ne.s32.totalorder %s2403_s15, %s2399_s14 }
   0xb   : > { %p226_p1 = scmp.eq.s32.totalorder %s225_s21, 0  ;;  %p239_p2 = scmp.eq.s32.totalorder %s2492_s17, 1 }
   0xc   : > { %p244_p3 = scmp.ne.s32.totalorder %s2399_s14, %s2395_s13  ;;  %p245_p4 = scmp.eq.s32.totalorder %s1918_s18, 1 }
   0xd   : > { %s2507_s22 = scalar_select %p226_p1, %s2403_s15, %s228_s20  }
   0xe   : > { %p2509_p5 = por %p239_p2, %p238_p0  ;;  %p2513_p6 = por %p245_p4, %p244_p3 }
   0xf   : > { %p1921_p7 = scmp.ge.s32.totalorder %s2407_s16, 1  ;;  %p320_p8 = scmp.lt.s32.totalorder %s2407_s16, 3 }
  0x11   : > { %p321_p9 = pnand %p1921_p7, %p320_p8 }
  0x12   : > { %s2898_s1 = sld [smem:[#allocation9_spill]] (!%p321_p9)  ;;  %p362_p10 = scmp.lt.s32.totalorder (!%p321_p9), %s2492_s17, 1 }
  0x13   : > { %324 = sbr.rel (%p321_p9) target bundleno = 1179 (0x49b), region = 56  ;;  %s2899_s0 = sld [smem:[#allocation8_spill]] (!%p321_p9) }
  0x14   : > { %s2743_s25 = sand.u32 (!%p321_p9), 1, %s2399_s14  }
  0x15   : > { %s1923_s26 = sshll.u32 (!%p321_p9), %s2743_s25, 4 }
  0x16   : > { %s2747_s27 = scalar_lea.vmem (!%p321_p9), [#allocation4], %s1923_s26 }
  0x17   : > { %s1824_s26 = sshll.u32 (!%p321_p9), %s2747_s27, 4  ;;  %s2804_s26 = int_to_ptr.vmem [resolvable:$true] %s1824_s26 }
  0x18   : > { %v2273_v0 = vld [vmem:[%s2898_s1 + $0x8] sm:$0xff]   ;;  %v2409_v1 = vmov 0.0   ;;  %v2274_v2 = vld [vmem:[%s2898_s1 + $0x18] sm:$0xff]   ;;  %v2275_v3 = vld [vmem:[%s2898_s1] sm:$0xff]   ;;  %vm2410_vm0 = vmmov 0   ;;  %s363_s18 = scalar_select %p362_p10, %s2492_s17, 1 }
  0x19   : > { %2056 = vmatprep.subr.bf16.mxu0 %v2409_v1  ;;  %2064 = vmatprep.subr.bf16.mxu1 %v2409_v1  ;;  %v2276_v4 = vld [vmem:[%s2898_s1 + $0x10] sm:$0xff]   ;;  %v2277_v5 = vld [vmem:[%s2898_s1 + $0x28] sm:$0xff]   ;;  %v2278_v6 = vld [vmem:[%s2898_s1 + $0x38] sm:$0xff]   ;;  %vm425_vm1 = vcmask 261120   ;;  %vm1141_vm2 = vcmask 130048   ;;  %vm1387_vm3 = vcmask 1043456  }
  0x1a   : > { %2057 = vmatpush3.bf16.msra.mxu0 %v2273_v0  ;;  %2060 = vmatprep.mubr.msk.bf16.mxu0 %vm2410_vm0, %v2409_v1  ;;  %s1924_s20 = sshll.u32 %s363_s18, 3  ;;  %v2279_v9 = vld [vmem:[%s2898_s1 + $0x20] sm:$0xff]   ;;  %v2280_v10 = vld [vmem:[%s2898_s1 + $0x30] sm:$0xff]   ;;  %v2281_v11 = vld [vmem:[%s2886_s3 + $0x8] sm:$0xff]   ;;  %vm1335_vm4 = vcmask 64512   ;;  %vm1330_vm5 = vcmask 60416  }
  0x1b   : > { %2065 = vmatpush3.bf16.msra.mxu1 %v2274_v2  ;;  %2058 = vmatprep.subr.bf16.mxu0 %v2409_v1  ;;  %s365_s28 = scalar_lea.vmem %s2899_s0, %s1924_s20  ;;  %v2282_v12 = vld [vmem:[%s2886_s3 + $0x18] sm:$0xff]   ;;  %v2283_v13 = vld [vmem:[%s2886_s3] sm:$0xff]   ;;  %v2284_v14 = vld [vmem:[%s2886_s3 + $0x10] sm:$0xff]   ;;  %s2317_s18 = scalar_lea.vmem %s2804_s26, 256 }
  0x1c   : > { %2066 = vmatprep.subr.bf16.mxu1 %v2409_v1  ;;  %2068 = vmatprep.mubr.msk.bf16.mxu1 %vm2410_vm0, %v2409_v1  ;;  %v367_v7 = vld [vmem:[%s365_s28] sm:$0xff]  ;;  %v2285_v15 = vld [vmem:[%s2886_s3 + $0x28] sm:$0xff]   ;;  %v2286_v16 = vld [vmem:[%s2886_s3 + $0x38] sm:$0xff]   ;;  %s1993_s28 = sshll.u32 %s2492_s17, 6  ;;  %p2318_p11 = scmp.ne.s32.totalorder %s2804_s26, %s2317_s18 }
  0x1d   : > { %v2552_v8 = vpack.c.bf16 %v367_v7, %v367_v7  ;;  %v2287_v17 = vld [vmem:[%s2886_s3 + $0x20] sm:$0xff]   ;;  %v2288_v18 = vld [vmem:[%s2886_s3 + $0x30] sm:$0xff]   ;;  %v2289_v19 = vld [vmem:[%s2888_s5 + $0x8] sm:$0xff]   ;;  %s2809_s11 = scalar_lea.hbm %s2893_s10, %s1993_s28  ;;  %s2411_s20 = smov [#allocation4]  }
  0x1e   : > { %2059 = vmatpush3.bf16.msra.mxu0 %v2275_v3  ;;  %v2290_v20 = vld [vmem:[%s2888_s5] sm:$0xff]   ;;  %v2291_v21 = vld [vmem:[%s2888_s5 + $0x18] sm:$0xff]   ;;  %v2292_v22 = vld [vmem:[%s2888_s5 + $0x10] sm:$0xff]   ;;  %p2319_p12 = pnand %p2318_p11, %p2509_p5  ;;  %s2321_s21 = sshll.u32 %s2411_s20, 4  ;;  %s2322_s21 = int_to_ptr.vmem [resolvable:$false] %s2321_s21 }
  0x1f   : > { %2067 = vmatpush3.bf16.msra.mxu1 %v2276_v4  ;;  %2072 = vmatprep.subr.bf16.mxu0 %v2409_v1  ;;  %v2293_v23 = vld [vmem:[%s2888_s5 + $0x28] sm:$0xff]   ;;  %v2294_v24 = vld [vmem:[%s2888_s5 + $0x20] sm:$0xff]   ;;  %v2295_v25 = vld [vmem:[%s2888_s5 + $0x38] sm:$0xff]   ;;  %p2324_p0 = scmp.lt.s32.totalorder %s2804_s26, %s2322_s21 }
  0x20   : > { %2080 = vmatprep.subr.bf16.mxu1 %v2409_v1  ;;  %v2296_v26 = vld [vmem:[%s2888_s5 + $0x30] sm:$0xff]   ;;  %v1941_v43 = vld [vmem:[%s2887_s4] ss:$0 sm:$0xff]  ;;  %v1942_v44 = vld [vmem:[%s2887_s4 + $0x1] ss:$0 sm:$0xff]  ;;  %p2320_p13 = pneg %p2319_p12 }
  0x21   : > { %2061 = vmatmul.mubr.msk.bf16.vlgmr.msra.gmra.mxu0 %vm425_vm1, %v2552_v8  ;;  %v1925_v53 = vld [vmem:[%s2885_s2] ss:$0 sm:$0xff]  ;;  %v1926_v54 = vld [vmem:[%s2885_s2 + $0x1] ss:$0 sm:$0xff]  ;;  %v1943_v61 = vld [vmem:[%s2887_s4 + $0x2] ss:$0 sm:$0xff] }
  0x22   : > { %2069 = vmatmul.mubr.msk.bf16.vlgmr.msra.gmra.mxu1 %vm425_vm1, %v2552_v8  ;;  %2073 = vmatpush3.bf16.msra.mxu0 %v2277_v5  ;;  %v1944_v62 = vld [vmem:[%s2887_s4 + $0x3] ss:$0 sm:$0xff] }
  0x23   : > { %2081 = vmatpush3.bf16.msra.mxu1 %v2278_v6  ;;  %2074 = vmatprep.subr.bf16.mxu0 %v2409_v1 }
  0x24   : > { %2082 = vmatprep.subr.bf16.mxu1 %v2409_v1  ;;  %2076 = vmatprep.mubr.msk.bf16.mxu0 %vm2410_vm0, %v2409_v1 }
  0x25   : > { %2084 = vmatprep.mubr.msk.bf16.mxu1 %vm2410_vm0, %v2409_v1 }
  0x26   : > { %2075 = vmatpush3.bf16.msra.mxu0 %v2279_v9 }
  0x27   : > { %2083 = vmatpush3.bf16.msra.mxu1 %v2280_v10  ;;  %2088 = vmatprep.subr.bf16.mxu0 %v2409_v1 }
  0x28   : > { %2096 = vmatprep.subr.bf16.mxu1 %v2409_v1 }
  0x29   : > { %2077 = vmatmul.mubr.msk.bf16.vlgmr.msra.gmra.mxu0 %vm425_vm1, %v2552_v8 }
  0x2a   : > { %2085 = vmatmul.mubr.msk.bf16.vlgmr.msra.gmra.mxu1 %vm425_vm1, %v2552_v8  ;;  %2089 = vmatpush3.bf16.msra.mxu0 %v2281_v11 }
  0x2b   : > { %2097 = vmatpush3.bf16.msra.mxu1 %v2282_v12  ;;  %2090 = vmatprep.subr.bf16.mxu0 %v2409_v1  ;;  %v1927_v12 = vld [vmem:[%s2885_s2 + $0x2] ss:$0 sm:$0xff] }
  0x2c   : > { %2098 = vmatprep.subr.bf16.mxu1 %v2409_v1  ;;  %2092 = vmatprep.mubr.msk.bf16.mxu0 %vm2410_vm0, %v2409_v1 }
  0x2d   : > { %2100 = vmatprep.mubr.msk.bf16.mxu1 %vm2410_vm0, %v2409_v1 }
  0x2e   : > { %2091 = vmatpush3.bf16.msra.mxu0 %v2283_v13  ;;  %v1928_v13 = vld [vmem:[%s2885_s2 + $0x3] ss:$0 sm:$0xff] }
  0x2f   : > { %2099 = vmatpush3.bf16.msra.mxu1 %v2284_v14  ;;  %2104 = vmatprep.subr.bf16.mxu0 %v2409_v1 }
  0x30   : > { %2112 = vmatprep.subr.bf16.mxu1 %v2409_v1 }
  0x31   : > { %2093 = vmatmul.mubr.msk.bf16.vlgmr.msra.gmra.mxu0 %vm425_vm1, %v2552_v8 }
  0x32   : > { %2101 = vmatmul.mubr.msk.bf16.vlgmr.msra.gmra.mxu1 %vm425_vm1, %v2552_v8  ;;  %2105 = vmatpush3.bf16.msra.mxu0 %v2285_v15 }
  0x33   : > { %2113 = vmatpush3.bf16.msra.mxu1 %v2286_v16  ;;  %2106 = vmatprep.subr.bf16.mxu0 %v2409_v1 }
  0x34   : > { %2114 = vmatprep.subr.bf16.mxu1 %v2409_v1  ;;  %2108 = vmatprep.mubr.msk.bf16.mxu0 %vm2410_vm0, %v2409_v1 }
  0x35   : > { %2116 = vmatprep.mubr.msk.bf16.mxu1 %vm2410_vm0, %v2409_v1 }
  0x36   : > { %2107 = vmatpush3.bf16.msra.mxu0 %v2287_v17 }
  0x37   : > { %2115 = vmatpush3.bf16.msra.mxu1 %v2288_v18  ;;  %2120 = vmatprep.subr.bf16.mxu0 %v2409_v1 }
  0x38   : > { %2128 = vmatprep.subr.bf16.mxu1 %v2409_v1 }
  0x39   : > { %2109 = vmatmul.mubr.msk.bf16.vlgmr.msra.gmra.mxu0 %vm425_vm1, %v2552_v8 }
  0x3a   : > { %2117 = vmatmul.mubr.msk.bf16.vlgmr.msra.gmra.mxu1 %vm425_vm1, %v2552_v8  ;;  %2124 = vmatprep.mubr.msk.bf16.mxu0 %vm2410_vm0, %v2409_v1 }
  0x3b   : > { %2132 = vmatprep.mubr.msk.bf16.mxu1 %vm2410_vm0, %v2409_v1  ;;  %2121 = vmatpush3.bf16.msra.mxu0 %v2289_v19 }
  0x3c   : > { %2122 = vmatprep.subr.bf16.mxu0 %v2409_v1  ;;  %2129 = vmatpush3.bf16.msra.mxu1 %v2291_v21 }
  0x3d   : > { %2130 = vmatprep.subr.bf16.mxu1 %v2409_v1 }
  0x3f   : > { %2123 = vmatpush3.bf16.msra.mxu0 %v2290_v20 }
  0x40   : > { %2136 = vmatprep.subr.bf16.mxu0 %v2409_v1  ;;  %2131 = vmatpush3.bf16.msra.mxu1 %v2292_v22 }
  0x41   : > { %2144 = vmatprep.subr.bf16.mxu1 %v2409_v1 }
  0x42   : > { %2125 = vmatmul.mubr.msk.bf16.vlgmr.msra.gmra.mxu0 %vm425_vm1, %v2552_v8 }
  0x43   : > { %2137 = vmatpush3.bf16.msra.mxu0 %v2293_v23  ;;  %2140 = vmatprep.mubr.msk.bf16.mxu0 %vm2410_vm0, %v2409_v1 }
  0x44   : > { %2138 = vmatprep.subr.bf16.mxu0 %v2409_v1  ;;  %2133 = vmatmul.mubr.msk.bf16.vlgmr.msra.gmra.mxu1 %vm425_vm1, %v2552_v8 }
  0x45   : > { %2145 = vmatpush3.bf16.msra.mxu1 %v2295_v25  ;;  %2148 = vmatprep.mubr.msk.bf16.mxu1 %vm2410_vm0, %v2409_v1 }
  0x46   : > { %2146 = vmatprep.subr.bf16.mxu1 %v2409_v1 }
  0x47   : > { %2139 = vmatpush3.bf16.msra.mxu0 %v2294_v24  ;;  %v1957_v24 = vld [vmem:[%s2889_s6] ss:$0 sm:$0xff] }
  0x48   : > { %2152 = vmatprep.subr.bf16.mxu0 %v2409_v1 }
  0x49   : > { %2147 = vmatpush3.bf16.msra.mxu1 %v2296_v26 }
  0x4a   : > { %2141 = vmatmul.mubr.msk.bf16.vlgmr.msra.gmra.mxu0 %vm425_vm1, %v2552_v8  ;;  %2158 = vmatprep.subr.bf16.mxu1 %v2409_v1 }
  0x4b   : > { %2154 = vmatprep.mubr.msk.bf16.mxu0 %vm2410_vm0, %v2409_v1 }
  0x4c   : > { %2149 = vmatmul.mubr.msk.bf16.vlgmr.msra.gmra.mxu1 %vm425_vm1, %v2552_v8 }
  0x4d   : > { %2160 = vmatprep.mubr.msk.bf16.mxu1 %vm2410_vm0, %v2409_v1 }
  0xe1   : > { %v463_v27 = vpop.f32.mrf.mxu0 }
  0xe2   : > { %v515_v28 = vpop.f32.mrf.mxu1  ;;  %v464_v63 = vadd.f32 %v1925_v53, %v463_v27 }
  0xe3   : > { %v2062_v29 = vpop.f32.mrf.mxu0  ;;  %v516_v0 = vadd.f32 %v1926_v54, %v515_v28  ;;  %v1958_v28 = vld [vmem:[%s2889_s6 + $0x1] ss:$0 sm:$0xff] }
  0xe4   : > { %v2070_v30 = vpop.f32.mrf.mxu1  ;;  %v1129_v8 = vpack.c.bf16 %v464_v63, %v464_v63 }
  0xe5   : > { %v466_v31 = vpop.f32.mrf.mxu0  ;;  %v1130_v9 = vpack.c.bf16 %v516_v0, %v516_v0 }
  0xe6   : > { %v518_v32 = vpop.f32.mrf.mxu1 }
  0xe7   : > { %v2063_v33 = vpop.f32.mrf.mxu0 }
  0xe8   : > { %v2071_v34 = vpop.f32.mrf.mxu1 }
  0xe9   : > { %v567_v35 = vpop.f32.mrf.mxu0 }
  0xea   : > { %v619_v36 = vpop.f32.mrf.mxu1  ;;  %v568_v20 = vadd.f32 %v1927_v12, %v567_v35 }
  0xeb   : > { %v2078_v37 = vpop.f32.mrf.mxu0  ;;  %v620_v21 = vadd.f32 %v1928_v13, %v619_v36  ;;  %v1959_v36 = vld [vmem:[%s2889_s6 + $0x2] ss:$0 sm:$0xff] }
  0xec   : > { %v2086_v38 = vpop.f32.mrf.mxu1  ;;  %v1131_v22 = vpack.c.bf16 %v568_v20, %v568_v20 }
  0xed   : > { %v570_v39 = vpop.f32.mrf.mxu0  ;;  %v1132_v23 = vpack.c.bf16 %v620_v21, %v620_v21 }
  0xee   : > { %v622_v40 = vpop.f32.mrf.mxu1 }
  0xef   : > { %v2079_v41 = vpop.f32.mrf.mxu0 }
  0xf0   : > { %v2087_v42 = vpop.f32.mrf.mxu1 }
  0xf1   : > { %v715_v45 = vpop.f32.mrf.mxu0 }
  0xf2   : > { %v767_v46 = vpop.f32.mrf.mxu1  ;;  %v716_v47 = vadd.f32 %v1941_v43, %v715_v45 }
  0xf3   : > { %v768_v48 = vadd.f32 %v1942_v44, %v767_v46  ;;  %v2094_v49 = vpop.f32.mrf.mxu0  ;;  %v1960_v44 = vld [vmem:[%s2889_s6 + $0x3] ss:$0 sm:$0xff] }
  0xf4   : > { %v2102_v50 = vpop.f32.mrf.mxu1  ;;  %v1133_v51 = vpack.c.bf16 %v716_v47, %v716_v47 }
  0xf5   : > { %v1134_v52 = vpack.c.bf16 %v768_v48, %v768_v48  ;;  %v718_v55 = vpop.f32.mrf.mxu0 }
  0xf6   : > { %v770_v56 = vpop.f32.mrf.mxu1  ;;  %v1146_v57 = vsel %vm1141_vm2, %v1133_v51, 0 }
  0xf7   : > { %v1192_v58 = vsel %vm1141_vm2, %v1134_v52, 0  ;;  %v2095_v59 = vpop.f32.mrf.mxu0  ;;  %2153 = vmatpush3.bf16.xpose.msra.mxu0 %v1146_v57 }
  0xf8   : > { %v2103_v60 = vpop.f32.mrf.mxu1  ;;  %2159 = vmatpush3.bf16.xpose.msra.mxu1 %v1192_v58  ;;  %2164 = vmatprep.subr.bf16.mxu0 %v2409_v1 }
  0xf9   : > { %2170 = vmatprep.subr.bf16.mxu1 %v2409_v1  ;;  %v819_v2 = vpop.f32.mrf.mxu0 }
  0xfa   : > { %v871_v3 = vpop.f32.mrf.mxu1  ;;  %v820_v4 = vadd.f32 %v1943_v61, %v819_v2 }
  0xfb   : > { %v872_v5 = vadd.f32 %v1944_v62, %v871_v3  ;;  %v2110_v6 = vpop.f32.mrf.mxu0 }
  0xfc   : > { %v2118_v7 = vpop.f32.mrf.mxu1  ;;  %v1135_v10 = vpack.c.bf16 %v820_v4, %v820_v4 }
  0xfd   : > { %v1136_v11 = vpack.c.bf16 %v872_v5, %v872_v5  ;;  %v822_v14 = vpop.f32.mrf.mxu0 }
  0xfe   : > { %v874_v15 = vpop.f32.mrf.mxu1  ;;  %v1238_v16 = vsel %vm1141_vm2, %v1135_v10, 0  ;;  %2155 = vmatmul.mubr.msk.bf16.vlgmr.msra.gmra.mxu0 %vm1141_vm2, %v1129_v8 }
  0xff   : > { %v1284_v17 = vsel %vm1141_vm2, %v1136_v11, 0  ;;  %2161 = vmatmul.mubr.msk.bf16.vlgmr.msra.gmra.mxu1 %vm1141_vm2, %v1130_v9  ;;  %v2111_v18 = vpop.f32.mrf.mxu0  ;;  %2165 = vmatpush3.bf16.xpose.msra.mxu0 %v1238_v16 }
 0x100   : > { %v2119_v19 = vpop.f32.mrf.mxu1  ;;  %2171 = vmatpush3.bf16.xpose.msra.mxu1 %v1284_v17  ;;  %2166 = vmatprep.mubr.msk.bf16.mxu0 %vm2410_vm0, %v2409_v1 }
 0x101   : > { %2172 = vmatprep.mubr.msk.bf16.mxu1 %vm2410_vm0, %v2409_v1  ;;  %2176 = vmatprep.subr.bf16.mxu0 %v2409_v1 }
 0x102   : > { %2182 = vmatprep.subr.bf16.mxu1 %v2409_v1  ;;  %v967_v25 = vpop.f32.mrf.mxu0 }
 0x103   : > { %v968_v26 = vadd.f32 %v1957_v24, %v967_v25 }
 0x104   : > { %v2126_v27 = vpop.f32.mrf.mxu0  ;;  %v1019_v31 = vpop.f32.mrf.mxu1 }
 0x105   : > { %v1137_v29 = vpack.c.bf16 %v968_v26, %v968_v26  ;;  %v1020_v33 = vadd.f32 %v1958_v28, %v1019_v31 }
 0x106   : > { %2167 = vmatmul.mubr.msk.bf16.vlgmr.msra.gmra.mxu0 %vm1141_vm2, %v1131_v22  ;;  %v970_v30 = vpop.f32.mrf.mxu0  ;;  %v2134_v35 = vpop.f32.mrf.mxu1 }
 0x107   : > { %2173 = vmatmul.mubr.msk.bf16.vlgmr.msra.gmra.mxu1 %vm1141_vm2, %v1132_v23  ;;  %2178 = vmatprep.mubr.msk.bf16.mxu0 %vm2410_vm0, %v2409_v1  ;;  %v1389_v32 = vsel %vm1387_vm3, %v1137_v29, 0  ;;  %v1138_v37 = vpack.c.bf16 %v1020_v33, %v1020_v33 }
 0x108   : > { %2184 = vmatprep.mubr.msk.bf16.mxu1 %vm2410_vm0, %v2409_v1  ;;  %v2127_v34 = vpop.f32.mrf.mxu0  ;;  %2177 = vmatpush3.bf16.msra.mxu0 %v1389_v32  ;;  %v1022_v38 = vpop.f32.mrf.mxu1 }
 0x109   : > { %2188 = vmatprep.subr.bf16.mxu0 %v2409_v1  ;;  %v1435_v40 = vsel %vm1387_vm3, %v1138_v37, 0 }
 0x10a   : > { %v1071_v39 = vpop.f32.mrf.mxu0  ;;  %v2135_v42 = vpop.f32.mrf.mxu1  ;;  %2183 = vmatpush3.bf16.msra.mxu1 %v1435_v40 }
 0x10b   : > { %v1072_v41 = vadd.f32 %v1959_v36, %v1071_v39  ;;  %2194 = vmatprep.subr.bf16.mxu1 %v2409_v1 }
 0x10c   : > { %v2142_v43 = vpop.f32.mrf.mxu0  ;;  %v1123_v47 = vpop.f32.mrf.mxu1 }
 0x10d   : > { %v1139_v45 = vpack.c.bf16 %v1072_v41, %v1072_v41  ;;  %v1124_v49 = vadd.f32 %v1960_v44, %v1123_v47 }
 0x10e   : > { %v1074_v46 = vpop.f32.mrf.mxu0  ;;  %v2150_v51 = vpop.f32.mrf.mxu1 }
 0x10f   : > { %v2737_v48 = vsel %vm1387_vm3, %v1139_v45, 0  ;;  %v1140_v52 = vpack.c.bf16 %v1124_v49, %v1124_v49 }
 0x110   : > { %v2143_v50 = vpop.f32.mrf.mxu0  ;;  %v1126_v53 = vpop.f32.mrf.mxu1 }
 0x111   : > { %v2740_v54 = vsel %vm1387_vm3, %v1140_v52, 0  ;;  %v2297_v50 = vld [vmem:[%s2890_s7] sm:$0xff]  }
 0x112   : > { %v2151_v55 = vpop.f32.mrf.mxu1 }
 0x1be   : > { %v1182_v56 = vpop.f32.mrf.mxu0 }
 0x1bf   : > { %v1228_v57 = vpop.f32.mrf.mxu1  ;;  %v1326_v58 = vpack.c.bf16 %v1182_v56, %v1182_v56  ;;  %v1336_v60 = vsel %vm1335_vm4, %v1182_v56, -inf }
 0x1c0   : > { %v1327_v59 = vpack.c.bf16 %v1228_v57, %v1228_v57  ;;  %1337 = vmax.xlane.f32.xlu0 %v1336_v60  ;;  %v2156_v62 = vpop.f32.mrf.mxu0  ;;  %v1339_v2 = vsel %vm1335_vm4, %v1228_v57, -inf }
 0x1c1   : > { %v2162_v61 = vpop.f32.mrf.mxu1  ;;  %1331 = vst.msk [vmem:[%s2747_s27] sm:$0xf] %vm1330_vm5, %v1326_v58 }
 0x1c2   : > { %1332 = vst.msk [vmem:[%s2747_s27 + $0x4] sm:$0xf] %vm1330_vm5, %v1327_v59  ;;  %v1185_v63 = vpop.f32.mrf.mxu0  ;;  %v2300_v61 = vld [vmem:[%s2890_s7 + $0x18] sm:$0xff]  }
 0x1c3   : > { %v1231_v0 = vpop.f32.mrf.mxu1 }
 0x1c4   : > { %1340 = vmax.xlane.f32.xlu0 %v1339_v2  ;;  %v2157_v4 = vpop.f32.mrf.mxu0 }
 0x1c5   : > { %v2163_v3 = vpop.f32.mrf.mxu1 }
 0x1c6   : > { %v1274_v5 = vpop.f32.mrf.mxu0 }
 0x1c7   : > { %v1320_v6 = vpop.f32.mrf.mxu1  ;;  %v1328_v7 = vpack.c.bf16 %v1274_v5, %v1274_v5  ;;  %v1342_v9 = vsel %vm1335_vm4, %v1274_v5, -inf }
 0x1c8   : > { %v1329_v8 = vpack.c.bf16 %v1320_v6, %v1320_v6  ;;  %1343 = vmax.xlane.f32.xlu1 %v1342_v9  ;;  %v2168_v11 = vpop.f32.mrf.mxu0  ;;  %v1345_v14 = vsel %vm1335_vm4, %v1320_v6, -inf }
 0x1c9   : > { %v2174_v10 = vpop.f32.mrf.mxu1  ;;  %1333 = vst.msk [vmem:[%s2747_s27 + $0x8] sm:$0xf] %vm1330_vm5, %v1328_v7 }
 0x1ca   : > { %1334 = vst.msk [vmem:[%s2747_s27 + $0xc] sm:$0xf] %vm1330_vm5, %v1329_v8  ;;  %v1277_v12 = vpop.f32.mrf.mxu0  ;;  %s2323_s27 = scalar_lea.vmem %s2322_s21, 512 }
 0x1cb   : > { %v1323_v13 = vpop.f32.mrf.mxu1  ;;  %p2325_p1 = scmp.lt.s32.totalorder %s2323_s27, %s2317_s18 }
 0x1cc   : > { %1346 = vmax.xlane.f32.xlu1 %v1345_v14  ;;  %v2169_v16 = vpop.f32.mrf.mxu0 }
 0x1cd   : > { %v2175_v15 = vpop.f32.mrf.mxu1  ;;  %p2326_p2 = por %p2325_p1, %p2324_p0 }
 0x1cf   : > { %p2327_p3 = pnand %p2326_p2, %p2320_p13 }
 0x249   : > { %v1338_v17 = vpop.xlane.xlu0 %1337 }
 0x24a   : > { %v1348_v18 = vsub.f32 %v1182_v56, %v1338_v17  ;;  %v2299_v56 = vld [vmem:[%s2890_s7 + $0x10] sm:$0xff]  }
 0x24c   : > { %v1352_v19 = vmul.f32 1.442695, %v1348_v18 }
 0x24d   : > { %v1341_v20 = vpop.xlane.xlu0 %1340 }
 0x24e   : > { %2301 = vpow2.f32 %v1352_v19  ;;  %v1349_v21 = vsub.f32 %v1228_v57, %v1341_v20 }
 0x250   : > { %v1354_v22 = vmul.f32 1.442695, %v1349_v21 }
 0x251   : > { %v1344_v23 = vpop.xlane.xlu1 %1343 }
 0x252   : > { %2303 = vpow2.f32 %v1354_v22  ;;  %v1350_v24 = vsub.f32 %v1274_v5, %v1344_v23 }
 0x254   : > { %v1356_v25 = vmul.f32 1.442695, %v1350_v24 }
 0x255   : > { %v1347_v26 = vpop.xlane.xlu1 %1346 }
 0x256   : > { %2305 = vpow2.f32 %v1356_v25  ;;  %v1351_v27 = vsub.f32 %v1320_v6, %v1347_v26 }
 0x258   : > { %v1358_v28 = vmul.f32 1.442695, %v1351_v27 }
 0x25a   : > { %2307 = vpow2.f32 %v1358_v28 }
 0x25b   : > { %v2302_v29 = vpop.eup %2301 }
 0x25c   : > { %v1360_v30 = vsel %vm1335_vm4, %v2302_v29, 0.0 }
 0x25d   : > { %1361 = vadd.xlane.f32.xlu0 %v1360_v30 }
 0x25f   : > { %v2304_v31 = vpop.eup %2303 }
 0x260   : > { %v1363_v32 = vsel %vm1335_vm4, %v2304_v31, 0.0 }
 0x261   : > { %1364 = vadd.xlane.f32.xlu1 %v1363_v32 }
 0x263   : > { %v2306_v33 = vpop.eup %2305 }
 0x264   : > { %v1366_v34 = vsel %vm1335_vm4, %v2306_v33, 0.0 }
 0x265   : > { %1367 = vadd.xlane.f32.xlu0 %v1366_v34 }
 0x267   : > { %v2308_v35 = vpop.eup %2307 }
 0x268   : > { %v1369_v36 = vsel %vm1335_vm4, %v2308_v35, 0.0 }
 0x269   : > { %1370 = vadd.xlane.f32.xlu1 %v1369_v36 }
 0x2e6   : > { %v1362_v37 = vpop.xlane.xlu0 %1361 }
 0x2e7   : > { %2309 = vrcp.f32 %v1362_v37 }
 0x2ea   : > { %v1365_v38 = vpop.xlane.xlu1 %1364 }
 0x2eb   : > { %2311 = vrcp.f32 %v1365_v38 }
 0x2ee   : > { %v1368_v39 = vpop.xlane.xlu0 %1367 }
 0x2ef   : > { %2313 = vrcp.f32 %v1368_v39 }
 0x2f2   : > { %v1371_v40 = vpop.xlane.xlu1 %1370 }
 0x2f3   : > { %2315 = vrcp.f32 %v1371_v40 }
 0x2f4   : > { %v2310_v41 = vpop.eup %2309 }
 0x2f5   : > { %v1376_v42 = vmul.f32 %v2310_v41, %v2302_v29 }
 0x2f7   : > { %v1380_v43 = vpack.c.bf16 %v1376_v42, %v1376_v42 }
 0x2f8   : > { %v2312_v44 = vpop.eup %2311 }
 0x2f9   : > { %2179 = vmatmul.mubr.msk.bf16.vlgmr.msra.gmra.mxu0 %vm1335_vm4, %v1380_v43  ;;  %v1377_v45 = vmul.f32 %v2312_v44, %v2304_v31 }
 0x2fa   : > { %2189 = vmatpush3.bf16.msra.mxu0 %v2737_v48  ;;  %2190 = vmatprep.mubr.msk.bf16.mxu0 %vm2410_vm0, %v2409_v1 }
 0x2fb   : > { %v1381_v46 = vpack.c.bf16 %v1377_v45, %v1377_v45  ;;  %2200 = vmatprep.subr.bf16.mxu0 %v2409_v1 }
 0x2fc   : > { %v2314_v47 = vpop.eup %2313 }
 0x2fd   : > { %2185 = vmatmul.mubr.msk.bf16.vlgmr.msra.gmra.mxu1 %vm1335_vm4, %v1381_v46  ;;  %v1378_v49 = vmul.f32 %v2314_v47, %v2306_v33 }
 0x2fe   : > { %2195 = vmatpush3.bf16.msra.mxu1 %v2740_v54  ;;  %2196 = vmatprep.mubr.msk.bf16.mxu1 %vm2410_vm0, %v2409_v1  ;;  %v2298_v54 = vld [vmem:[%s2890_s7 + $0x8] sm:$0xff]  }
 0x2ff   : > { %v1382_v48 = vpack.c.bf16 %v1378_v49, %v1378_v49  ;;  %2206 = vmatprep.subr.bf16.mxu1 %v2409_v1 }
 0x300   : > { %v2316_v51 = vpop.eup %2315 }
 0x301   : > { %2191 = vmatmul.mubr.msk.bf16.vlgmr.msra.gmra.mxu0 %vm1335_vm4, %v1382_v48  ;;  %v1379_v52 = vmul.f32 %v2316_v51, %v2308_v35 }
 0x302   : > { %2201 = vmatpush3.bf16.msra.mxu0 %v2297_v50  ;;  %2202 = vmatprep.mubr.msk.bf16.mxu0 %vm2410_vm0, %v2409_v1 }
 0x303   : > { %v1383_v53 = vpack.c.bf16 %v1379_v52, %v1379_v52  ;;  %2212 = vmatprep.subr.bf16.mxu0 %v2409_v1 }
 0x305   : > { %2197 = vmatmul.mubr.msk.bf16.vlgmr.msra.gmra.mxu1 %vm1335_vm4, %v1383_v53 }
 0x306   : > { %2208 = vmatprep.mubr.msk.bf16.mxu1 %vm2410_vm0, %v2409_v1  ;;  %2207 = vmatpush3.bf16.msra.mxu1 %v2298_v54 }
 0x307   : > { %2218 = vmatprep.subr.bf16.mxu1 %v2409_v1 }
 0x3b9   : > { %v1425_v55 = vpop.f32.mrf.mxu0 }
 0x3ba   : > { %v1569_v57 = vpack.c.bf16 %v1425_v55, %v1425_v55 }
 0x3bb   : > { %v2180_v58 = vpop.f32.mrf.mxu0 }
 0x3bc   : > { %2203 = vmatmul.mubr.msk.bf16.vlgmr.msra.gmra.mxu0 %vm1141_vm2, %v1569_v57 }
 0x3bd   : > { %v1428_v59 = vpop.f32.mrf.mxu0  ;;  %v1471_v60 = vpop.f32.mrf.mxu1  ;;  %2213 = vmatpush3.bf16.msra.mxu0 %v2299_v56  ;;  %2214 = vmatprep.mubr.msk.bf16.mxu0 %vm2410_vm0, %v2409_v1 }
 0x3be   : > { %v1570_v62 = vpack.c.bf16 %v1471_v60, %v1471_v60 }
 0x3bf   : > { %v2181_v63 = vpop.f32.mrf.mxu0  ;;  %v2186_v0 = vpop.f32.mrf.mxu1 }
 0x3c0   : > { %2209 = vmatmul.mubr.msk.bf16.vlgmr.msra.gmra.mxu1 %vm1141_vm2, %v1570_v62 }
 0x3c1   : > { %v1474_v2 = vpop.f32.mrf.mxu1  ;;  %v1517_v3 = vpop.f32.mrf.mxu0  ;;  %2219 = vmatpush3.bf16.msra.mxu1 %v2300_v61  ;;  %2220 = vmatprep.mubr.msk.bf16.mxu1 %vm2410_vm0, %v2409_v1 }
 0x3c2   : > { %v1571_v4 = vpack.c.bf16 %v1517_v3, %v1517_v3 }
 0x3c3   : > { %v2187_v5 = vpop.f32.mrf.mxu1  ;;  %v2192_v6 = vpop.f32.mrf.mxu0 }
 0x3c4   : > { %2215 = vmatmul.mubr.msk.bf16.vlgmr.msra.gmra.mxu0 %vm1141_vm2, %v1571_v4 }
 0x3c5   : > { %v1520_v7 = vpop.f32.mrf.mxu0  ;;  %v1563_v8 = vpop.f32.mrf.mxu1 }
 0x3c6   : > { %v1572_v9 = vpack.c.bf16 %v1563_v8, %v1563_v8 }
 0x3c7   : > { %v2193_v10 = vpop.f32.mrf.mxu0  ;;  %v2198_v11 = vpop.f32.mrf.mxu1 }
 0x3c8   : > { %2221 = vmatmul.mubr.msk.bf16.vlgmr.msra.gmra.mxu1 %vm1141_vm2, %v1572_v9 }
 0x3c9   : > { %v1566_v12 = vpop.f32.mrf.mxu1 }
 0x3cb   : > { %v2199_v13 = vpop.f32.mrf.mxu1 }
 0x3cc   : > { %2330 = shalt.err (!%p2327_p3)
}
 0x3cd   : > { %s2331_s28 = scalar_lea.hbm %s2809_s11, 256  ;;  %s2335_s20 = scalar_lea.hbm %s2893_s10, 512 }
 0x3ce   : > { %p2332_p4 = scmp.ne.s32.totalorder %s2809_s11, %s2331_s28  ;;  %p2336_p9 = scmp.lt.s32.totalorder %s2809_s11, %s2893_s10 }
 0x3cf   : > { %p2337_p10 = scmp.lt.s32.totalorder %s2335_s20, %s2331_s28 }
 0x3d0   : > { %p2333_p7 = pnand %p2332_p4, %p2509_p5 }
 0x3d1   : > { %p2338_p11 = por %p2337_p10, %p2336_p9 }
 0x3d2   : > { %p2334_p8 = pneg %p2333_p7 }
 0x3d4   : > { %p2339_p12 = pnand %p2338_p11, %p2334_p8 }
 0x3d6   : > { %2342 = shalt.err (!%p2339_p12)
}
 0x3d7   : > { %s2412_s18 = smov 64   ;;  %s2413_s21 = smov 128   ;;  %v1989_v31 = vld [vmem:[%s2891_s8] ss:$0 sm:$0xff] }
 0x3d8   : > { %s2414_s27 = smov 4   ;;  %s2900_s1 = scalar_lea.sflag [#allocation5], %s2743_s25 }
 0x3d9   : > { %2225 = dma.vmem_to_hbm [thread:$0]  (%p2509_p5), %s2804_s26, 256, %s2809_s11, %s2900_s1, %s2412_s18, %s2413_s21, %s2414_s27  }
 0x3da   : > { %s1922_s0 = sshll.u32 %s2743_s25, 3  ;;  %s1992_s11 = sshll.u32 %s2492_s17, 7 }
 0x3db   : > { %s354_s12 = scalar_lea.vmem [#allocation2], %s1922_s0  ;;  %s2846_s20 = scalar_lea.hbm %s2892_s9, %s1992_s11 }
 0x3dc   : > { %s1812_s28 = sshll.u32 %s354_s12, 4  ;;  %s1794_s18 = scalar_lea.sflag [#allocation3], %s2743_s25  ;;  %s1813_s28 = int_to_ptr.vmem [resolvable:$true] %s1812_s28 }
 0x3dd   : > { %s2343_s21 = scalar_lea.vmem %s1813_s28, 128  ;;  %s2415_s17 = smov [#allocation2]  }
 0x3de   : > { %p2344_p13 = scmp.ne.s32.totalorder %s1813_s28, %s2343_s21  ;;  %s2347_s27 = sshll.u32 %s2415_s17, 4  ;;  %s2348_s27 = int_to_ptr.vmem [resolvable:$false] %s2347_s27 }
 0x3df   : > { %s2349_s0 = scalar_lea.vmem %s2348_s27, 256  ;;  %p2350_p2 = scmp.lt.s32.totalorder %s1813_s28, %s2348_s27 }
 0x3e0   : > { %p2345_p0 = pnand %p2344_p13, %p2509_p5  ;;  %p2351_p3 = scmp.lt.s32.totalorder %s2349_s0, %s2343_s21 }
 0x3e2   : > { %p2346_p1 = pneg %p2345_p0  ;;  %p2352_p4 = por %p2351_p3, %p2350_p2 }
 0x3e4   : > { %p2353_p7 = pnand %p2352_p4, %p2346_p1 }
 0x47c   : > { %v1624_v1 = vpop.f32.mrf.mxu0 }
 0x47d   : > { %v1777_v22 = vsel %vm425_vm1, %v1624_v1, 0.0 }
 0x47e   : > { %v2204_v14 = vpop.f32.mrf.mxu0 }
 0x480   : > { %v1627_v15 = vpop.f32.mrf.mxu0  ;;  %v1673_v16 = vpop.f32.mrf.mxu1 }
 0x481   : > { %v1778_v19 = vsel %vm425_vm1, %v1673_v16, 0.0 }
 0x482   : > { %v2205_v17 = vpop.f32.mrf.mxu0  ;;  %v2210_v18 = vpop.f32.mrf.mxu1  ;;  %v1779_v24 = vadd.f32 %v1778_v19, %v1777_v22 }
 0x484   : > { %v1676_v20 = vpop.f32.mrf.mxu1  ;;  %v1722_v21 = vpop.f32.mrf.mxu0 }
 0x485   : > { %v1780_v23 = vsel %vm425_vm1, %v1722_v21, 0.0 }
 0x486   : > { %v2211_v25 = vpop.f32.mrf.mxu1  ;;  %v2216_v26 = vpop.f32.mrf.mxu0  ;;  %v1781_v27 = vadd.f32 %v1780_v23, %v1779_v24 }
 0x488   : > { %v1725_v28 = vpop.f32.mrf.mxu0  ;;  %v1771_v29 = vpop.f32.mrf.mxu1 }
 0x489   : > { %v1782_v30 = vsel %vm425_vm1, %v1771_v29, 0.0 }
 0x48a   : > { %v1783_v32 = vadd.f32 %v1782_v30, %v1781_v27  ;;  %v2217_v33 = vpop.f32.mrf.mxu0  ;;  %v2222_v34 = vpop.f32.mrf.mxu1 }
 0x48c   : > { %v1791_v35 = vadd.f32 %v1989_v31, %v1783_v32  ;;  %v1774_v36 = vpop.f32.mrf.mxu1 }
 0x48e   : > { %v2223_v37 = vpop.f32.mrf.mxu1  ;;  %1792 = vst.msk [vmem:[%s354_s12] sm:$0xff] %vm425_vm1, %v1791_v35 }
 0x48f   : > { %2356 = shalt.err (!%p2353_p7)
}
 0x490   : > { %s2357_s1 = scalar_lea.hbm %s2846_s20, 128  ;;  %s2361_s11 = scalar_lea.hbm %s2892_s9, 256 }
 0x491   : > { %p2358_p8 = scmp.ne.s32.totalorder %s2846_s20, %s2357_s1  ;;  %p2362_p11 = scmp.lt.s32.totalorder %s2846_s20, %s2892_s9 }
 0x492   : > { %p2363_p12 = scmp.lt.s32.totalorder %s2361_s11, %s2357_s1 }
 0x493   : > { %p2359_p9 = pnand %p2358_p8, %p2509_p5 }
 0x494   : > { %p2364_p13 = por %p2363_p12, %p2362_p11 }
 0x495   : > { %p2360_p10 = pneg %p2359_p9 }
 0x497   : > { %p2365_p0 = pnand %p2364_p13, %p2360_p10 }
 0x499   : > { %2368 = shalt.err (!%p2365_p0)
}
 0x49a   : > { %2224 = dma.vmem_to_hbm [thread:$0]  (%p2509_p5), %s1813_s28, 128, %s2846_s20, %s1794_s18  }
 0x49b PF: > { %p2235_p1 = scmp.ge.s32.totalorder %s2407_s16, 2  ;;  %s1839_s30 = sand.u32 1, %s2395_s13  }
 0x49c   : > { %s1840_s21 = scalar_lea.sflag [#allocation3], %s1839_s30 }
 0x49d   : > { %p2229_p2 = pnand %p2235_p1, %p2513_p6 }
 0x49f   : > { %p2230_p3 = pneg %p2229_p2 }
 0x4a1   : > { %2386 = dma.done.wait (%p2230_p3), %s1840_s21, 128  }
 0x4a2   : > { %2388 = vsyncadd (%p2230_p3), %s1840_s21, 4294967168  ;;  %s1849_s17 = scalar_lea.sflag [#allocation5], %s1839_s30 }
 0x4a3   : > { %2390 = dma.done.wait (%p2230_p3), %s1849_s17, 256  }
 0x4a4   : > { %2392 = vsyncadd (%p2230_p3), %s1849_s17, 4294967040  ;;  %p24_p5 = scmp.ge.s32.totalorder %s2496_s19, 4   ;;  %s2901_s13 = smov %s2399_s14 }
 0x4a5   : > { %s2902_s14 = smov %s2403_s15  ;;  %s2903_s15 = smov %s2507_s22 }
 0x4a6   : > { %s2904_s16 = smov %s2496_s19  ;;  %26 = sbr.rel (!%p24_p5) target bundleno = 8 (0x8), region = 108 }
 0x4ab   :  { %1854 = vsyncpa [#allocation3], 1 }
 0x4ac   :  { %1856 = vsyncpa [#allocation3 + $0x1], 1 }
 0x4ad   :  { %1857 = vsyncpa [#allocation5], 1 }
 0x4ae   :  { %1859 = vsyncpa [#allocation5 + $0x1], 1 }

// kernel: tpu_custom_call.1
= control target key start
LH: loop header
LB: loop body
LE: loop exit
PB: predicated region body
PF: predicated region fallthrough
CT: control target
= control target key end

     0   :  { %s2883_s0 = inlined_call_operand.vmem [shape: f32[2,8,32], index: 0, kind: input, shape index: {}]   ;;  %s2884_s1 = inlined_call_operand.vmem [shape: bf16[4,32,16], index: 1, kind: input, shape index: {}]   ;;  %s2885_s2 = inlined_call_operand.vmem [shape: f32[4,1,16], index: 2, kind: input, shape index: {}]   ;;  %s2886_s3 = inlined_call_operand.vmem [shape: bf16[4,32,16], index: 3, kind: input, shape index: {}]   ;;  %s2887_s4 = inlined_call_operand.vmem [shape: f32[4,1,16], index: 4, kind: input, shape index: {}]   ;;  %s2888_s5 = inlined_call_operand.vmem [shape: bf16[4,32,16], index: 5, kind: input, shape index: {}]   ;;  %s2889_s6 = inlined_call_operand.vmem [shape: f32[4,1,16], index: 6, kind: input, shape index: {}]   ;;  %s2890_s7 = inlined_call_operand.vmem [shape: bf16[4,16,32], index: 7, kind: input, shape index: {}]   ;;  %s2891_s8 = inlined_call_operand.vmem [shape: f32[1,32], index: 8, kind: input, shape index: {}]   ;;  %s2892_s9 = inlined_call_operand.hbm [shape: f32[2,8,32], index: 9, kind: output, shape index: {0}]   ;;  %s2893_s10 = inlined_call_operand.hbm [shape: bf16[4,2,8,8], index: 10, kind: output, shape index: {1}]  }
   0x1   :  { %2894 = sst [smem:[#allocation8_spill]] %s2883_s0 }
   0x2   :  { %2895 = sst [smem:[#allocation9_spill]] %s2884_s1 }
   0x3   :  { %16 = vsyncpa [#allocation3], 0 }
   0x4   :  { %18 = vsyncpa [#allocation3 + $0x1], 0 }
   0x5   :  { %19 = vsyncpa [#allocation5], 0 }
   0x6   :  { %21 = vsyncpa [#allocation5 + $0x1], 0  ;;  %s2471_s13 = smov 0   ;;  %s2473_s14 = smov 0  }
   0x7   :  { %s2475_s15 = smov 0   ;;  %s2477_s16 = smov 0  }
   0x8 LB: > { %s2492_s17 = sadd.s32 4294967295, %s2407_s16   ;;  %s1918_s18 = sadd.s32 4294967294, %s2407_s16   ;;  %s2407_s16 = sphi %s2477_s16, %s2904_s16   ;;  %s2403_s15 = sphi %s2475_s15, %s2903_s15   ;;  %s2399_s14 = sphi %s2473_s14, %s2902_s14   ;;  %s2395_s13 = sphi %s2471_s13, %s2901_s13  }
   0x9   : > { %s2496_s19 = sadd.s32 1, %s2407_s16   ;;  %s228_s20 = sadd.s32 1, %s2403_s15 }
   0xa   : > { %s225_s21 = ssub.s32 %s2407_s16, %s2496_s19  ;;  %p238_p0 = scmp.ne.s32.totalorder %s2403_s15, %s2399_s14 }
   0xb   : > { %p226_p1 = scmp.eq.s32.totalorder %s225_s21, 0  ;;  %p239_p2 = scmp.eq.s32.totalorder %s2492_s17, 1 }
   0xc   : > { %p244_p3 = scmp.ne.s32.totalorder %s2399_s14, %s2395_s13  ;;  %p245_p4 = scmp.eq.s32.totalorder %s1918_s18, 1 }
   0xd   : > { %s2507_s22 = scalar_select %p226_p1, %s2403_s15, %s228_s20  }
   0xe   : > { %p2509_p5 = por %p239_p2, %p238_p0  ;;  %p2513_p6 = por %p245_p4, %p244_p3 }
   0xf   : > { %p1921_p7 = scmp.ge.s32.totalorder %s2407_s16, 1  ;;  %p320_p8 = scmp.lt.s32.totalorder %s2407_s16, 3 }
  0x11   : > { %p321_p9 = pnand %p1921_p7, %p320_p8 }
  0x12   : > { %s2898_s1 = sld [smem:[#allocation9_spill]] (!%p321_p9)  ;;  %p362_p10 = scmp.lt.s32.totalorder (!%p321_p9), %s2492_s17, 1 }
  0x13   : > { %324 = sbr.rel (%p321_p9) target bundleno = 1179 (0x49b), region = 56  ;;  %s2899_s0 = sld [smem:[#allocation8_spill]] (!%p321_p9) }
  0x14   : > { %s2743_s25 = sand.u32 (!%p321_p9), 1, %s2399_s14  }
  0x15   : > { %s1923_s26 = sshll.u32 (!%p321_p9), %s2743_s25, 4 }
  0x16   : > { %s2747_s27 = scalar_lea.vmem (!%p321_p9), [#allocation4], %s1923_s26 }
  0x17   : > { %s1824_s26 = sshll.u32 (!%p321_p9), %s2747_s27, 4  ;;  %s2804_s26 = int_to_ptr.vmem [resolvable:$true] %s1824_s26 }
  0x18   : > { %v2273_v0 = vld [vmem:[%s2898_s1 + $0x8] sm:$0xff]   ;;  %v2409_v1 = vmov 0.0   ;;  %v2274_v2 = vld [vmem:[%s2898_s1 + $0x18] sm:$0xff]   ;;  %v2275_v3 = vld [vmem:[%s2898_s1] sm:$0xff]   ;;  %vm2410_vm0 = vmmov 0   ;;  %s363_s18 = scalar_select %p362_p10, %s2492_s17, 1 }
  0x19   : > { %2056 = vmatprep.subr.bf16.mxu0 %v2409_v1  ;;  %2064 = vmatprep.subr.bf16.mxu1 %v2409_v1  ;;  %v2276_v4 = vld [vmem:[%s2898_s1 + $0x10] sm:$0xff]   ;;  %v2277_v5 = vld [vmem:[%s2898_s1 + $0x28] sm:$0xff]   ;;  %v2278_v6 = vld [vmem:[%s2898_s1 + $0x38] sm:$0xff]   ;;  %vm425_vm1 = vcmask 261120   ;;  %vm1141_vm2 = vcmask 130048   ;;  %vm1387_vm3 = vcmask 1043456  }
  0x1a   : > { %2057 = vmatpush3.bf16.msra.mxu0 %v2273_v0  ;;  %2060 = vmatprep.mubr.msk.bf16.mxu0 %vm2410_vm0, %v2409_v1  ;;  %s1924_s20 = sshll.u32 %s363_s18, 3  ;;  %v2279_v9 = vld [vmem:[%s2898_s1 + $0x20] sm:$0xff]   ;;  %v2280_v10 = vld [vmem:[%s2898_s1 + $0x30] sm:$0xff]   ;;  %v2281_v11 = vld [vmem:[%s2886_s3 + $0x8] sm:$0xff]   ;;  %vm1335_vm4 = vcmask 64512   ;;  %vm1330_vm5 = vcmask 60416  }
  0x1b   : > { %2065 = vmatpush3.bf16.msra.mxu1 %v2274_v2  ;;  %2058 = vmatprep.subr.bf16.mxu0 %v2409_v1  ;;  %s365_s28 = scalar_lea.vmem %s2899_s0, %s1924_s20  ;;  %v2282_v12 = vld [vmem:[%s2886_s3 + $0x18] sm:$0xff]   ;;  %v2283_v13 = vld [vmem:[%s2886_s3] sm:$0xff]   ;;  %v2284_v14 = vld [vmem:[%s2886_s3 + $0x10] sm:$0xff]   ;;  %s2317_s18 = scalar_lea.vmem %s2804_s26, 256 }
  0x1c   : > { %2066 = vmatprep.subr.bf16.mxu1 %v2409_v1  ;;  %2068 = vmatprep.mubr.msk.bf16.mxu1 %vm2410_vm0, %v2409_v1  ;;  %v367_v7 = vld [vmem:[%s365_s28] sm:$0xff]  ;;  %v2285_v15 = vld [vmem:[%s2886_s3 + $0x28] sm:$0xff]   ;;  %v2286_v16 = vld [vmem:[%s2886_s3 + $0x38] sm:$0xff]   ;;  %s1993_s28 = sshll.u32 %s2492_s17, 6  ;;  %p2318_p11 = scmp.ne.s32.totalorder %s2804_s26, %s2317_s18 }
  0x1d   : > { %v2552_v8 = vpack.c.bf16 %v367_v7, %v367_v7  ;;  %v2287_v17 = vld [vmem:[%s2886_s3 + $0x20] sm:$0xff]   ;;  %v2288_v18 = vld [vmem:[%s2886_s3 + $0x30] sm:$0xff]   ;;  %v2289_v19 = vld [vmem:[%s2888_s5 + $0x8] sm:$0xff]   ;;  %s2809_s11 = scalar_lea.hbm %s2893_s10, %s1993_s28  ;;  %s2411_s20 = smov [#allocation4]  }
  0x1e   : > { %2059 = vmatpush3.bf16.msra.mxu0 %v2275_v3  ;;  %v2290_v20 = vld [vmem:[%s2888_s5] sm:$0xff]   ;;  %v2291_v21 = vld [vmem:[%s2888_s5 + $0x18] sm:$0xff]   ;;  %v2292_v22 = vld [vmem:[%s2888_s5 + $0x10] sm:$0xff]   ;;  %p2319_p12 = pnand %p2318_p11, %p2509_p5  ;;  %s2321_s21 = sshll.u32 %s2411_s20, 4  ;;  %s2322_s21 = int_to_ptr.vmem [resolvable:$false] %s2321_s21 }
  0x1f   : > { %2067 = vmatpush3.bf16.msra.mxu1 %v2276_v4  ;;  %2072 = vmatprep.subr.bf16.mxu0 %v2409_v1  ;;  %v2293_v23 = vld [vmem:[%s2888_s5 + $0x28] sm:$0xff]   ;;  %v2294_v24 = vld [vmem:[%s2888_s5 + $0x20] sm:$0xff]   ;;  %v2295_v25 = vld [vmem:[%s2888_s5 + $0x38] sm:$0xff]   ;;  %p2324_p0 = scmp.lt.s32.totalorder %s2804_s26, %s2322_s21 }
  0x20   : > { %2080 = vmatprep.subr.bf16.mxu1 %v2409_v1  ;;  %v2296_v26 = vld [vmem:[%s2888_s5 + $0x30] sm:$0xff]   ;;  %v1941_v43 = vld [vmem:[%s2887_s4] ss:$0 sm:$0xff]  ;;  %v1942_v44 = vld [vmem:[%s2887_s4 + $0x1] ss:$0 sm:$0xff]  ;;  %p2320_p13 = pneg %p2319_p12 }
  0x21   : > { %2061 = vmatmul.mubr.msk.bf16.vlgmr.msra.gmra.mxu0 %vm425_vm1, %v2552_v8  ;;  %v1925_v53 = vld [vmem:[%s2885_s2] ss:$0 sm:$0xff]  ;;  %v1926_v54 = vld [vmem:[%s2885_s2 + $0x1] ss:$0 sm:$0xff]  ;;  %v1943_v61 = vld [vmem:[%s2887_s4 + $0x2] ss:$0 sm:$0xff] }
  0x22   : > { %2069 = vmatmul.mubr.msk.bf16.vlgmr.msra.gmra.mxu1 %vm425_vm1, %v2552_v8  ;;  %2073 = vmatpush3.bf16.msra.mxu0 %v2277_v5  ;;  %v1944_v62 = vld [vmem:[%s2887_s4 + $0x3] ss:$0 sm:$0xff] }
  0x23   : > { %2081 = vmatpush3.bf16.msra.mxu1 %v2278_v6  ;;  %2074 = vmatprep.subr.bf16.mxu0 %v2409_v1 }
  0x24   : > { %2082 = vmatprep.subr.bf16.mxu1 %v2409_v1  ;;  %2076 = vmatprep.mubr.msk.bf16.mxu0 %vm2410_vm0, %v2409_v1 }
  0x25   : > { %2084 = vmatprep.mubr.msk.bf16.mxu1 %vm2410_vm0, %v2409_v1 }
  0x26   : > { %2075 = vmatpush3.bf16.msra.mxu0 %v2279_v9 }
  0x27   : > { %2083 = vmatpush3.bf16.msra.mxu1 %v2280_v10  ;;  %2088 = vmatprep.subr.bf16.mxu0 %v2409_v1 }
  0x28   : > { %2096 = vmatprep.subr.bf16.mxu1 %v2409_v1 }
  0x29   : > { %2077 = vmatmul.mubr.msk.bf16.vlgmr.msra.gmra.mxu0 %vm425_vm1, %v2552_v8 }
  0x2a   : > { %2085 = vmatmul.mubr.msk.bf16.vlgmr.msra.gmra.mxu1 %vm425_vm1, %v2552_v8  ;;  %2089 = vmatpush3.bf16.msra.mxu0 %v2281_v11 }
  0x2b   : > { %2097 = vmatpush3.bf16.msra.mxu1 %v2282_v12  ;;  %2090 = vmatprep.subr.bf16.mxu0 %v2409_v1  ;;  %v1927_v12 = vld [vmem:[%s2885_s2 + $0x2] ss:$0 sm:$0xff] }
  0x2c   : > { %2098 = vmatprep.subr.bf16.mxu1 %v2409_v1  ;;  %2092 = vmatprep.mubr.msk.bf16.mxu0 %vm2410_vm0, %v2409_v1 }
  0x2d   : > { %2100 = vmatprep.mubr.msk.bf16.mxu1 %vm2410_vm0, %v2409_v1 }
  0x2e   : > { %2091 = vmatpush3.bf16.msra.mxu0 %v2283_v13  ;;  %v1928_v13 = vld [vmem:[%s2885_s2 + $0x3] ss:$0 sm:$0xff] }
  0x2f   : > { %2099 = vmatpush3.bf16.msra.mxu1 %v2284_v14  ;;  %2104 = vmatprep.subr.bf16.mxu0 %v2409_v1 }
  0x30   : > { %2112 = vmatprep.subr.bf16.mxu1 %v2409_v1 }
  0x31   : > { %2093 = vmatmul.mubr.msk.bf16.vlgmr.msra.gmra.mxu0 %vm425_vm1, %v2552_v8 }
  0x32   : > { %2101 = vmatmul.mubr.msk.bf16.vlgmr.msra.gmra.mxu1 %vm425_vm1, %v2552_v8  ;;  %2105 = vmatpush3.bf16.msra.mxu0 %v2285_v15 }
  0x33   : > { %2113 = vmatpush3.bf16.msra.mxu1 %v2286_v16  ;;  %2106 = vmatprep.subr.bf16.mxu0 %v2409_v1 }
  0x34   : > { %2114 = vmatprep.subr.bf16.mxu1 %v2409_v1  ;;  %2108 = vmatprep.mubr.msk.bf16.mxu0 %vm2410_vm0, %v2409_v1 }
  0x35   : > { %2116 = vmatprep.mubr.msk.bf16.mxu1 %vm2410_vm0, %v2409_v1 }
  0x36   : > { %2107 = vmatpush3.bf16.msra.mxu0 %v2287_v17 }
  0x37   : > { %2115 = vmatpush3.bf16.msra.mxu1 %v2288_v18  ;;  %2120 = vmatprep.subr.bf16.mxu0 %v2409_v1 }
  0x38   : > { %2128 = vmatprep.subr.bf16.mxu1 %v2409_v1 }
  0x39   : > { %2109 = vmatmul.mubr.msk.bf16.vlgmr.msra.gmra.mxu0 %vm425_vm1, %v2552_v8 }
  0x3a   : > { %2117 = vmatmul.mubr.msk.bf16.vlgmr.msra.gmra.mxu1 %vm425_vm1, %v2552_v8  ;;  %2124 = vmatprep.mubr.msk.bf16.mxu0 %vm2410_vm0, %v2409_v1 }
  0x3b   : > { %2132 = vmatprep.mubr.msk.bf16.mxu1 %vm2410_vm0, %v2409_v1  ;;  %2121 = vmatpush3.bf16.msra.mxu0 %v2289_v19 }
  0x3c   : > { %2122 = vmatprep.subr.bf16.mxu0 %v2409_v1  ;;  %2129 = vmatpush3.bf16.msra.mxu1 %v2291_v21 }
  0x3d   : > { %2130 = vmatprep.subr.bf16.mxu1 %v2409_v1 }
  0x3f   : > { %2123 = vmatpush3.bf16.msra.mxu0 %v2290_v20 }
  0x40   : > { %2136 = vmatprep.subr.bf16.mxu0 %v2409_v1  ;;  %2131 = vmatpush3.bf16.msra.mxu1 %v2292_v22 }
  0x41   : > { %2144 = vmatprep.subr.bf16.mxu1 %v2409_v1 }
  0x42   : > { %2125 = vmatmul.mubr.msk.bf16.vlgmr.msra.gmra.mxu0 %vm425_vm1, %v2552_v8 }
  0x43   : > { %2137 = vmatpush3.bf16.msra.mxu0 %v2293_v23  ;;  %2140 = vmatprep.mubr.msk.bf16.mxu0 %vm2410_vm0, %v2409_v1 }
  0x44   : > { %2138 = vmatprep.subr.bf16.mxu0 %v2409_v1  ;;  %2133 = vmatmul.mubr.msk.bf16.vlgmr.msra.gmra.mxu1 %vm425_vm1, %v2552_v8 }
  0x45   : > { %2145 = vmatpush3.bf16.msra.mxu1 %v2295_v25  ;;  %2148 = vmatprep.mubr.msk.bf16.mxu1 %vm2410_vm0, %v2409_v1 }
  0x46   : > { %2146 = vmatprep.subr.bf16.mxu1 %v2409_v1 }
  0x47   : > { %2139 = vmatpush3.bf16.msra.mxu0 %v2294_v24  ;;  %v1957_v24 = vld [vmem:[%s2889_s6] ss:$0 sm:$0xff] }
  0x48   : > { %2152 = vmatprep.subr.bf16.mxu0 %v2409_v1 }
  0x49   : > { %2147 = vmatpush3.bf16.msra.mxu1 %v2296_v26 }
  0x4a   : > { %2141 = vmatmul.mubr.msk.bf16.vlgmr.msra.gmra.mxu0 %vm425_vm1, %v2552_v8  ;;  %2158 = vmatprep.subr.bf16.mxu1 %v2409_v1 }
  0x4b   : > { %2154 = vmatprep.mubr.msk.bf16.mxu0 %vm2410_vm0, %v2409_v1 }
  0x4c   : > { %2149 = vmatmul.mubr.msk.bf16.vlgmr.msra.gmra.mxu1 %vm425_vm1, %v2552_v8 }
  0x4d   : > { %2160 = vmatprep.mubr.msk.bf16.mxu1 %vm2410_vm0, %v2409_v1 }
  0xe1   : > { %v463_v27 = vpop.f32.mrf.mxu0 }
  0xe2   : > { %v515_v28 = vpop.f32.mrf.mxu1  ;;  %v464_v63 = vadd.f32 %v1925_v53, %v463_v27 }
  0xe3   : > { %v2062_v29 = vpop.f32.mrf.mxu0  ;;  %v516_v0 = vadd.f32 %v1926_v54, %v515_v28  ;;  %v1958_v28 = vld [vmem:[%s2889_s6 + $0x1] ss:$0 sm:$0xff] }
  0xe4   : > { %v2070_v30 = vpop.f32.mrf.mxu1  ;;  %v1129_v8 = vpack.c.bf16 %v464_v63, %v464_v63 }
  0xe5   : > { %v466_v31 = vpop.f32.mrf.mxu0  ;;  %v1130_v9 = vpack.c.bf16 %v516_v0, %v516_v0 }
  0xe6   : > { %v518_v32 = vpop.f32.mrf.mxu1 }
  0xe7   : > { %v2063_v33 = vpop.f32.mrf.mxu0 }
  0xe8   : > { %v2071_v34 = vpop.f32.mrf.mxu1 }
  0xe9   : > { %v567_v35 = vpop.f32.mrf.mxu0 }
  0xea   : > { %v619_v36 = vpop.f32.mrf.mxu1  ;;  %v568_v20 = vadd.f32 %v1927_v12, %v567_v35 }
  0xeb   : > { %v2078_v37 = vpop.f32.mrf.mxu0  ;;  %v620_v21 = vadd.f32 %v1928_v13, %v619_v36  ;;  %v1959_v36 = vld [vmem:[%s2889_s6 + $0x2] ss:$0 sm:$0xff] }
  0xec   : > { %v2086_v38 = vpop.f32.mrf.mxu1  ;;  %v1131_v22 = vpack.c.bf16 %v568_v20, %v568_v20 }
  0xed   : > { %v570_v39 = vpop.f32.mrf.mxu0  ;;  %v1132_v23 = vpack.c.bf16 %v620_v21, %v620_v21 }
  0xee   : > { %v622_v40 = vpop.f32.mrf.mxu1 }
  0xef   : > { %v2079_v41 = vpop.f32.mrf.mxu0 }
  0xf0   : > { %v2087_v42 = vpop.f32.mrf.mxu1 }
  0xf1   : > { %v715_v45 = vpop.f32.mrf.mxu0 }
  0xf2   : > { %v767_v46 = vpop.f32.mrf.mxu1  ;;  %v716_v47 = vadd.f32 %v1941_v43, %v715_v45 }
  0xf3   : > { %v768_v48 = vadd.f32 %v1942_v44, %v767_v46  ;;  %v2094_v49 = vpop.f32.mrf.mxu0  ;;  %v1960_v44 = vld [vmem:[%s2889_s6 + $0x3] ss:$0 sm:$0xff] }
  0xf4   : > { %v2102_v50 = vpop.f32.mrf.mxu1  ;;  %v1133_v51 = vpack.c.bf16 %v716_v47, %v716_v47 }
  0xf5   : > { %v1134_v52 = vpack.c.bf16 %v768_v48, %v768_v48  ;;  %v718_v55 = vpop.f32.mrf.mxu0 }
  0xf6   : > { %v770_v56 = vpop.f32.mrf.mxu1  ;;  %v1146_v57 = vsel %vm1141_vm2, %v1133_v51, 0 }
  0xf7   : > { %v1192_v58 = vsel %vm1141_vm2, %v1134_v52, 0  ;;  %v2095_v59 = vpop.f32.mrf.mxu0  ;;  %2153 = vmatpush3.bf16.xpose.msra.mxu0 %v1146_v57 }
  0xf8   : > { %v2103_v60 = vpop.f32.mrf.mxu1  ;;  %2159 = vmatpush3.bf16.xpose.msra.mxu1 %v1192_v58  ;;  %2164 = vmatprep.subr.bf16.mxu0 %v2409_v1 }
  0xf9   : > { %2170 = vmatprep.subr.bf16.mxu1 %v2409_v1  ;;  %v819_v2 = vpop.f32.mrf.mxu0 }
  0xfa   : > { %v871_v3 = vpop.f32.mrf.mxu1  ;;  %v820_v4 = vadd.f32 %v1943_v61, %v819_v2 }
  0xfb   : > { %v872_v5 = vadd.f32 %v1944_v62, %v871_v3  ;;  %v2110_v6 = vpop.f32.mrf.mxu0 }
  0xfc   : > { %v2118_v7 = vpop.f32.mrf.mxu1  ;;  %v1135_v10 = vpack.c.bf16 %v820_v4, %v820_v4 }
  0xfd   : > { %v1136_v11 = vpack.c.bf16 %v872_v5, %v872_v5  ;;  %v822_v14 = vpop.f32.mrf.mxu0 }
  0xfe   : > { %v874_v15 = vpop.f32.mrf.mxu1  ;;  %v1238_v16 = vsel %vm1141_vm2, %v1135_v10, 0  ;;  %2155 = vmatmul.mubr.msk.bf16.vlgmr.msra.gmra.mxu0 %vm1141_vm2, %v1129_v8 }
  0xff   : > { %v1284_v17 = vsel %vm1141_vm2, %v1136_v11, 0  ;;  %2161 = vmatmul.mubr.msk.bf16.vlgmr.msra.gmra.mxu1 %vm1141_vm2, %v1130_v9  ;;  %v2111_v18 = vpop.f32.mrf.mxu0  ;;  %2165 = vmatpush3.bf16.xpose.msra.mxu0 %v1238_v16 }
 0x100   : > { %v2119_v19 = vpop.f32.mrf.mxu1  ;;  %2171 = vmatpush3.bf16.xpose.msra.mxu1 %v1284_v17  ;;  %2166 = vmatprep.mubr.msk.bf16.mxu0 %vm2410_vm0, %v2409_v1 }
 0x101   : > { %2172 = vmatprep.mubr.msk.bf16.mxu1 %vm2410_vm0, %v2409_v1  ;;  %2176 = vmatprep.subr.bf16.mxu0 %v2409_v1 }
 0x102   : > { %2182 = vmatprep.subr.bf16.mxu1 %v2409_v1  ;;  %v967_v25 = vpop.f32.mrf.mxu0 }
 0x103   : > { %v968_v26 = vadd.f32 %v1957_v24, %v967_v25 }
 0x104   : > { %v2126_v27 = vpop.f32.mrf.mxu0  ;;  %v1019_v31 = vpop.f32.mrf.mxu1 }
 0x105   : > { %v1137_v29 = vpack.c.bf16 %v968_v26, %v968_v26  ;;  %v1020_v33 = vadd.f32 %v1958_v28, %v1019_v31 }
 0x106   : > { %2167 = vmatmul.mubr.msk.bf16.vlgmr.msra.gmra.mxu0 %vm1141_vm2, %v1131_v22  ;;  %v970_v30 = vpop.f32.mrf.mxu0  ;;  %v2134_v35 = vpop.f32.mrf.mxu1 }
 0x107   : > { %2173 = vmatmul.mubr.msk.bf16.vlgmr.msra.gmra.mxu1 %vm1141_vm2, %v1132_v23  ;;  %2178 = vmatprep.mubr.msk.bf16.mxu0 %vm2410_vm0, %v2409_v1  ;;  %v1389_v32 = vsel %vm1387_vm3, %v1137_v29, 0  ;;  %v1138_v37 = vpack.c.bf16 %v1020_v33, %v1020_v33 }
 0x108   : > { %2184 = vmatprep.mubr.msk.bf16.mxu1 %vm2410_vm0, %v2409_v1  ;;  %v2127_v34 = vpop.f32.mrf.mxu0  ;;  %2177 = vmatpush3.bf16.msra.mxu0 %v1389_v32  ;;  %v1022_v38 = vpop.f32.mrf.mxu1 }
 0x109   : > { %2188 = vmatprep.subr.bf16.mxu0 %v2409_v1  ;;  %v1435_v40 = vsel %vm1387_vm3, %v1138_v37, 0 }
 0x10a   : > { %v1071_v39 = vpop.f32.mrf.mxu0  ;;  %v2135_v42 = vpop.f32.mrf.mxu1  ;;  %2183 = vmatpush3.bf16.msra.mxu1 %v1435_v40 }
 0x10b   : > { %v1072_v41 = vadd.f32 %v1959_v36, %v1071_v39  ;;  %2194 = vmatprep.subr.bf16.mxu1 %v2409_v1 }
 0x10c   : > { %v2142_v43 = vpop.f32.mrf.mxu0  ;;  %v1123_v47 = vpop.f32.mrf.mxu1 }
 0x10d   : > { %v1139_v45 = vpack.c.bf16 %v1072_v41, %v1072_v41  ;;  %v1124_v49 = vadd.f32 %v1960_v44, %v1123_v47 }
 0x10e   : > { %v1074_v46 = vpop.f32.mrf.mxu0  ;;  %v2150_v51 = vpop.f32.mrf.mxu1 }
 0x10f   : > { %v2737_v48 = vsel %vm1387_vm3, %v1139_v45, 0  ;;  %v1140_v52 = vpack.c.bf16 %v1124_v49, %v1124_v49 }
 0x110   : > { %v2143_v50 = vpop.f32.mrf.mxu0  ;;  %v1126_v53 = vpop.f32.mrf.mxu1 }
 0x111   : > { %v2740_v54 = vsel %vm1387_vm3, %v1140_v52, 0  ;;  %v2297_v50 = vld [vmem:[%s2890_s7] sm:$0xff]  }
 0x112   : > { %v2151_v55 = vpop.f32.mrf.mxu1 }
 0x1be   : > { %v1182_v56 = vpop.f32.mrf.mxu0 }
 0x1bf   : > { %v1228_v57 = vpop.f32.mrf.mxu1  ;;  %v1326_v58 = vpack.c.bf16 %v1182_v56, %v1182_v56  ;;  %v1336_v60 = vsel %vm1335_vm4, %v1182_v56, -inf }
 0x1c0   : > { %v1327_v59 = vpack.c.bf16 %v1228_v57, %v1228_v57  ;;  %1337 = vmax.xlane.f32.xlu0 %v1336_v60  ;;  %v2156_v62 = vpop.f32.mrf.mxu0  ;;  %v1339_v2 = vsel %vm1335_vm4, %v1228_v57, -inf }
 0x1c1   : > { %v2162_v61 = vpop.f32.mrf.mxu1  ;;  %1331 = vst.msk [vmem:[%s2747_s27] sm:$0xf] %vm1330_vm5, %v1326_v58 }
 0x1c2   : > { %1332 = vst.msk [vmem:[%s2747_s27 + $0x4] sm:$0xf] %vm1330_vm5, %v1327_v59  ;;  %v1185_v63 = vpop.f32.mrf.mxu0  ;;  %v2300_v61 = vld [vmem:[%s2890_s7 + $0x18] sm:$0xff]  }
 0x1c3   : > { %v1231_v0 = vpop.f32.mrf.mxu1 }
 0x1c4   : > { %1340 = vmax.xlane.f32.xlu0 %v1339_v2  ;;  %v2157_v4 = vpop.f32.mrf.mxu0 }
 0x1c5   : > { %v2163_v3 = vpop.f32.mrf.mxu1 }
 0x1c6   : > { %v1274_v5 = vpop.f32.mrf.mxu0 }
 0x1c7   : > { %v1320_v6 = vpop.f32.mrf.mxu1  ;;  %v1328_v7 = vpack.c.bf16 %v1274_v5, %v1274_v5  ;;  %v1342_v9 = vsel %vm1335_vm4, %v1274_v5, -inf }
 0x1c8   : > { %v1329_v8 = vpack.c.bf16 %v1320_v6, %v1320_v6  ;;  %1343 = vmax.xlane.f32.xlu1 %v1342_v9  ;;  %v2168_v11 = vpop.f32.mrf.mxu0  ;;  %v1345_v14 = vsel %vm1335_vm4, %v1320_v6, -inf }
 0x1c9   : > { %v2174_v10 = vpop.f32.mrf.mxu1  ;;  %1333 = vst.msk [vmem:[%s2747_s27 + $0x8] sm:$0xf] %vm1330_vm5, %v1328_v7 }
 0x1ca   : > { %1334 = vst.msk [vmem:[%s2747_s27 + $0xc] sm:$0xf] %vm1330_vm5, %v1329_v8  ;;  %v1277_v12 = vpop.f32.mrf.mxu0  ;;  %s2323_s27 = scalar_lea.vmem %s2322_s21, 512 }
 0x1cb   : > { %v1323_v13 = vpop.f32.mrf.mxu1  ;;  %p2325_p1 = scmp.lt.s32.totalorder %s2323_s27, %s2317_s18 }
 0x1cc   : > { %1346 = vmax.xlane.f32.xlu1 %v1345_v14  ;;  %v2169_v16 = vpop.f32.mrf.mxu0 }
 0x1cd   : > { %v2175_v15 = vpop.f32.mrf.mxu1  ;;  %p2326_p2 = por %p2325_p1, %p2324_p0 }
 0x1cf   : > { %p2327_p3 = pnand %p2326_p2, %p2320_p13 }
 0x249   : > { %v1338_v17 = vpop.xlane.xlu0 %1337 }
 0x24a   : > { %v1348_v18 = vsub.f32 %v1182_v56, %v1338_v17  ;;  %v2299_v56 = vld [vmem:[%s2890_s7 + $0x10] sm:$0xff]  }
 0x24c   : > { %v1352_v19 = vmul.f32 1.442695, %v1348_v18 }
 0x24d   : > { %v1341_v20 = vpop.xlane.xlu0 %1340 }
 0x24e   : > { %2301 = vpow2.f32 %v1352_v19  ;;  %v1349_v21 = vsub.f32 %v1228_v57, %v1341_v20 }
 0x250   : > { %v1354_v22 = vmul.f32 1.442695, %v1349_v21 }
 0x251   : > { %v1344_v23 = vpop.xlane.xlu1 %1343 }
 0x252   : > { %2303 = vpow2.f32 %v1354_v22  ;;  %v1350_v24 = vsub.f32 %v1274_v5, %v1344_v23 }
 0x254   : > { %v1356_v25 = vmul.f32 1.442695, %v1350_v24 }
 0x255   : > { %v1347_v26 = vpop.xlane.xlu1 %1346 }
 0x256   : > { %2305 = vpow2.f32 %v1356_v25  ;;  %v1351_v27 = vsub.f32 %v1320_v6, %v1347_v26 }
 0x258   : > { %v1358_v28 = vmul.f32 1.442695, %v1351_v27 }
 0x25a   : > { %2307 = vpow2.f32 %v1358_v28 }
 0x25b   : > { %v2302_v29 = vpop.eup %2301 }
 0x25c   : > { %v1360_v30 = vsel %vm1335_vm4, %v2302_v29, 0.0 }
 0x25d   : > { %1361 = vadd.xlane.f32.xlu0 %v1360_v30 }
 0x25f   : > { %v2304_v31 = vpop.eup %2303 }
 0x260   : > { %v1363_v32 = vsel %vm1335_vm4, %v2304_v31, 0.0 }
 0x261   : > { %1364 = vadd.xlane.f32.xlu1 %v1363_v32 }
 0x263   : > { %v2306_v33 = vpop.eup %2305 }
 0x264   : > { %v1366_v34 = vsel %vm1335_vm4, %v2306_v33, 0.0 }
 0x265   : > { %1367 = vadd.xlane.f32.xlu0 %v1366_v34 }
 0x267   : > { %v2308_v35 = vpop.eup %2307 }
 0x268   : > { %v1369_v36 = vsel %vm1335_vm4, %v2308_v35, 0.0 }
 0x269   : > { %1370 = vadd.xlane.f32.xlu1 %v1369_v36 }
 0x2e6   : > { %v1362_v37 = vpop.xlane.xlu0 %1361 }
 0x2e7   : > { %2309 = vrcp.f32 %v1362_v37 }
 0x2ea   : > { %v1365_v38 = vpop.xlane.xlu1 %1364 }
 0x2eb   : > { %2311 = vrcp.f32 %v1365_v38 }
 0x2ee   : > { %v1368_v39 = vpop.xlane.xlu0 %1367 }
 0x2ef   : > { %2313 = vrcp.f32 %v1368_v39 }
 0x2f2   : > { %v1371_v40 = vpop.xlane.xlu1 %1370 }
 0x2f3   : > { %2315 = vrcp.f32 %v1371_v40 }
 0x2f4   : > { %v2310_v41 = vpop.eup %2309 }
 0x2f5   : > { %v1376_v42 = vmul.f32 %v2310_v41, %v2302_v29 }
 0x2f7   : > { %v1380_v43 = vpack.c.bf16 %v1376_v42, %v1376_v42 }
 0x2f8   : > { %v2312_v44 = vpop.eup %2311 }
 0x2f9   : > { %2179 = vmatmul.mubr.msk.bf16.vlgmr.msra.gmra.mxu0 %vm1335_vm4, %v1380_v43  ;;  %v1377_v45 = vmul.f32 %v2312_v44, %v2304_v31 }
 0x2fa   : > { %2189 = vmatpush3.bf16.msra.mxu0 %v2737_v48  ;;  %2190 = vmatprep.mubr.msk.bf16.mxu0 %vm2410_vm0, %v2409_v1 }
 0x2fb   : > { %v1381_v46 = vpack.c.bf16 %v1377_v45, %v1377_v45  ;;  %2200 = vmatprep.subr.bf16.mxu0 %v2409_v1 }
 0x2fc   : > { %v2314_v47 = vpop.eup %2313 }
 0x2fd   : > { %2185 = vmatmul.mubr.msk.bf16.vlgmr.msra.gmra.mxu1 %vm1335_vm4, %v1381_v46  ;;  %v1378_v49 = vmul.f32 %v2314_v47, %v2306_v33 }
 0x2fe   : > { %2195 = vmatpush3.bf16.msra.mxu1 %v2740_v54  ;;  %2196 = vmatprep.mubr.msk.bf16.mxu1 %vm2410_vm0, %v2409_v1  ;;  %v2298_v54 = vld [vmem:[%s2890_s7 + $0x8] sm:$0xff]  }
 0x2ff   : > { %v1382_v48 = vpack.c.bf16 %v1378_v49, %v1378_v49  ;;  %2206 = vmatprep.subr.bf16.mxu1 %v2409_v1 }
 0x300   : > { %v2316_v51 = vpop.eup %2315 }
 0x301   : > { %2191 = vmatmul.mubr.msk.bf16.vlgmr.msra.gmra.mxu0 %vm1335_vm4, %v1382_v48  ;;  %v1379_v52 = vmul.f32 %v2316_v51, %v2308_v35 }
 0x302   : > { %2201 = vmatpush3.bf16.msra.mxu0 %v2297_v50  ;;  %2202 = vmatprep.mubr.msk.bf16.mxu0 %vm2410_vm0, %v2409_v1 }
 0x303   : > { %v1383_v53 = vpack.c.bf16 %v1379_v52, %v1379_v52  ;;  %2212 = vmatprep.subr.bf16.mxu0 %v2409_v1 }
 0x305   : > { %2197 = vmatmul.mubr.msk.bf16.vlgmr.msra.gmra.mxu1 %vm1335_vm4, %v1383_v53 }
 0x306   : > { %2208 = vmatprep.mubr.msk.bf16.mxu1 %vm2410_vm0, %v2409_v1  ;;  %2207 = vmatpush3.bf16.msra.mxu1 %v2298_v54 }
 0x307   : > { %2218 = vmatprep.subr.bf16.mxu1 %v2409_v1 }
 0x3b9   : > { %v1425_v55 = vpop.f32.mrf.mxu0 }
 0x3ba   : > { %v1569_v57 = vpack.c.bf16 %v1425_v55, %v1425_v55 }
 0x3bb   : > { %v2180_v58 = vpop.f32.mrf.mxu0 }
 0x3bc   : > { %2203 = vmatmul.mubr.msk.bf16.vlgmr.msra.gmra.mxu0 %vm1141_vm2, %v1569_v57 }
 0x3bd   : > { %v1428_v59 = vpop.f32.mrf.mxu0  ;;  %v1471_v60 = vpop.f32.mrf.mxu1  ;;  %2213 = vmatpush3.bf16.msra.mxu0 %v2299_v56  ;;  %2214 = vmatprep.mubr.msk.bf16.mxu0 %vm2410_vm0, %v2409_v1 }
 0x3be   : > { %v1570_v62 = vpack.c.bf16 %v1471_v60, %v1471_v60 }
 0x3bf   : > { %v2181_v63 = vpop.f32.mrf.mxu0  ;;  %v2186_v0 = vpop.f32.mrf.mxu1 }
 0x3c0   : > { %2209 = vmatmul.mubr.msk.bf16.vlgmr.msra.gmra.mxu1 %vm1141_vm2, %v1570_v62 }
 0x3c1   : > { %v1474_v2 = vpop.f32.mrf.mxu1  ;;  %v1517_v3 = vpop.f32.mrf.mxu0  ;;  %2219 = vmatpush3.bf16.msra.mxu1 %v2300_v61  ;;  %2220 = vmatprep.mubr.msk.bf16.mxu1 %vm2410_vm0, %v2409_v1 }
 0x3c2   : > { %v1571_v4 = vpack.c.bf16 %v1517_v3, %v1517_v3 }
 0x3c3   : > { %v2187_v5 = vpop.f32.mrf.mxu1  ;;  %v2192_v6 = vpop.f32.mrf.mxu0 }
 0x3c4   : > { %2215 = vmatmul.mubr.msk.bf16.vlgmr.msra.gmra.mxu0 %vm1141_vm2, %v1571_v4 }
 0x3c5   : > { %v1520_v7 = vpop.f32.mrf.mxu0  ;;  %v1563_v8 = vpop.f32.mrf.mxu1 }
 0x3c6   : > { %v1572_v9 = vpack.c.bf16 %v1563_v8, %v1563_v8 }
 0x3c7   : > { %v2193_v10 = vpop.f32.mrf.mxu0  ;;  %v2198_v11 = vpop.f32.mrf.mxu1 }
 0x3c8   : > { %2221 = vmatmul.mubr.msk.bf16.vlgmr.msra.gmra.mxu1 %vm1141_vm2, %v1572_v9 }
 0x3c9   : > { %v1566_v12 = vpop.f32.mrf.mxu1 }
 0x3cb   : > { %v2199_v13 = vpop.f32.mrf.mxu1 }
 0x3cc   : > { %2330 = shalt.err (!%p2327_p3)
}
 0x3cd   : > { %s2331_s28 = scalar_lea.hbm %s2809_s11, 256  ;;  %s2335_s20 = scalar_lea.hbm %s2893_s10, 512 }
 0x3ce   : > { %p2332_p4 = scmp.ne.s32.totalorder %s2809_s11, %s2331_s28  ;;  %p2336_p9 = scmp.lt.s32.totalorder %s2809_s11, %s2893_s10 }
 0x3cf   : > { %p2337_p10 = scmp.lt.s32.totalorder %s2335_s20, %s2331_s28 }
 0x3d0   : > { %p2333_p7 = pnand %p2332_p4, %p2509_p5 }
 0x3d1   : > { %p2338_p11 = por %p2337_p10, %p2336_p9 }
 0x3d2   : > { %p2334_p8 = pneg %p2333_p7 }
 0x3d4   : > { %p2339_p12 = pnand %p2338_p11, %p2334_p8 }
 0x3d6   : > { %2342 = shalt.err (!%p2339_p12)
}
 0x3d7   : > { %s2412_s18 = smov 64   ;;  %s2413_s21 = smov 128   ;;  %v1989_v31 = vld [vmem:[%s2891_s8] ss:$0 sm:$0xff] }
 0x3d8   : > { %s2414_s27 = smov 4   ;;  %s2900_s1 = scalar_lea.sflag [#allocation5], %s2743_s25 }
 0x3d9   : > { %2225 = dma.vmem_to_hbm [thread:$0]  (%p2509_p5), %s2804_s26, 256, %s2809_s11, %s2900_s1, %s2412_s18, %s2413_s21, %s2414_s27  }
 0x3da   : > { %s1922_s0 = sshll.u32 %s2743_s25, 3  ;;  %s1992_s11 = sshll.u32 %s2492_s17, 7 }
 0x3db   : > { %s354_s12 = scalar_lea.vmem [#allocation2], %s1922_s0  ;;  %s2846_s20 = scalar_lea.hbm %s2892_s9, %s1992_s11 }
 0x3dc   : > { %s1812_s28 = sshll.u32 %s354_s12, 4  ;;  %s1794_s18 = scalar_lea.sflag [#allocation3], %s2743_s25  ;;  %s1813_s28 = int_to_ptr.vmem [resolvable:$true] %s1812_s28 }
 0x3dd   : > { %s2343_s21 = scalar_lea.vmem %s1813_s28, 128  ;;  %s2415_s17 = smov [#allocation2]  }
 0x3de   : > { %p2344_p13 = scmp.ne.s32.totalorder %s1813_s28, %s2343_s21  ;;  %s2347_s27 = sshll.u32 %s2415_s17, 4  ;;  %s2348_s27 = int_to_ptr.vmem [resolvable:$false] %s2347_s27 }
 0x3df   : > { %s2349_s0 = scalar_lea.vmem %s2348_s27, 256  ;;  %p2350_p2 = scmp.lt.s32.totalorder %s1813_s28, %s2348_s27 }
 0x3e0   : > { %p2345_p0 = pnand %p2344_p13, %p2509_p5  ;;  %p2351_p3 = scmp.lt.s32.totalorder %s2349_s0, %s2343_s21 }
 0x3e2   : > { %p2346_p1 = pneg %p2345_p0  ;;  %p2352_p4 = por %p2351_p3, %p2350_p2 }
 0x3e4   : > { %p2353_p7 = pnand %p2352_p4, %p2346_p1 }
 0x47c   : > { %v1624_v1 = vpop.f32.mrf.mxu0 }
 0x47d   : > { %v1777_v22 = vsel %vm425_vm1, %v1624_v1, 0.0 }
 0x47e   : > { %v2204_v14 = vpop.f32.mrf.mxu0 }
 0x480   : > { %v1627_v15 = vpop.f32.mrf.mxu0  ;;  %v1673_v16 = vpop.f32.mrf.mxu1 }
 0x481   : > { %v1778_v19 = vsel %vm425_vm1, %v1673_v16, 0.0 }
 0x482   : > { %v2205_v17 = vpop.f32.mrf.mxu0  ;;  %v2210_v18 = vpop.f32.mrf.mxu1  ;;  %v1779_v24 = vadd.f32 %v1778_v19, %v1777_v22 }
 0x484   : > { %v1676_v20 = vpop.f32.mrf.mxu1  ;;  %v1722_v21 = vpop.f32.mrf.mxu0 }
 0x485   : > { %v1780_v23 = vsel %vm425_vm1, %v1722_v21, 0.0 }
 0x486   : > { %v2211_v25 = vpop.f32.mrf.mxu1  ;;  %v2216_v26 = vpop.f32.mrf.mxu0  ;;  %v1781_v27 = vadd.f32 %v1780_v23, %v1779_v24 }
 0x488   : > { %v1725_v28 = vpop.f32.mrf.mxu0  ;;  %v1771_v29 = vpop.f32.mrf.mxu1 }
 0x489   : > { %v1782_v30 = vsel %vm425_vm1, %v1771_v29, 0.0 }
 0x48a   : > { %v1783_v32 = vadd.f32 %v1782_v30, %v1781_v27  ;;  %v2217_v33 = vpop.f32.mrf.mxu0  ;;  %v2222_v34 = vpop.f32.mrf.mxu1 }
 0x48c   : > { %v1791_v35 = vadd.f32 %v1989_v31, %v1783_v32  ;;  %v1774_v36 = vpop.f32.mrf.mxu1 }
 0x48e   : > { %v2223_v37 = vpop.f32.mrf.mxu1  ;;  %1792 = vst.msk [vmem:[%s354_s12] sm:$0xff] %vm425_vm1, %v1791_v35 }
 0x48f   : > { %2356 = shalt.err (!%p2353_p7)
}
 0x490   : > { %s2357_s1 = scalar_lea.hbm %s2846_s20, 128  ;;  %s2361_s11 = scalar_lea.hbm %s2892_s9, 256 }
 0x491   : > { %p2358_p8 = scmp.ne.s32.totalorder %s2846_s20, %s2357_s1  ;;  %p2362_p11 = scmp.lt.s32.totalorder %s2846_s20, %s2892_s9 }
 0x492   : > { %p2363_p12 = scmp.lt.s32.totalorder %s2361_s11, %s2357_s1 }
 0x493   : > { %p2359_p9 = pnand %p2358_p8, %p2509_p5 }
 0x494   : > { %p2364_p13 = por %p2363_p12, %p2362_p11 }
 0x495   : > { %p2360_p10 = pneg %p2359_p9 }
 0x497   : > { %p2365_p0 = pnand %p2364_p13, %p2360_p10 }
 0x499   : > { %2368 = shalt.err (!%p2365_p0)
}
 0x49a   : > { %2224 = dma.vmem_to_hbm [thread:$0]  (%p2509_p5), %s1813_s28, 128, %s2846_s20, %s1794_s18  }
 0x49b PF: > { %p2235_p1 = scmp.ge.s32.totalorder %s2407_s16, 2  ;;  %s1839_s30 = sand.u32 1, %s2395_s13  }
 0x49c   : > { %s1840_s21 = scalar_lea.sflag [#allocation3], %s1839_s30 }
 0x49d   : > { %p2229_p2 = pnand %p2235_p1, %p2513_p6 }
 0x49f   : > { %p2230_p3 = pneg %p2229_p2 }
 0x4a1   : > { %2386 = dma.done.wait (%p2230_p3), %s1840_s21, 128  }
 0x4a2   : > { %2388 = vsyncadd (%p2230_p3), %s1840_s21, 4294967168  ;;  %s1849_s17 = scalar_lea.sflag [#allocation5], %s1839_s30 }
 0x4a3   : > { %2390 = dma.done.wait (%p2230_p3), %s1849_s17, 256  }
 0x4a4   : > { %2392 = vsyncadd (%p2230_p3), %s1849_s17, 4294967040  ;;  %p24_p5 = scmp.ge.s32.totalorder %s2496_s19, 4   ;;  %s2901_s13 = smov %s2399_s14 }
 0x4a5   : > { %s2902_s14 = smov %s2403_s15  ;;  %s2903_s15 = smov %s2507_s22 }
 0x4a6   : > { %s2904_s16 = smov %s2496_s19  ;;  %26 = sbr.rel (!%p24_p5) target bundleno = 8 (0x8), region = 108 }
 0x4ab   :  { %1854 = vsyncpa [#allocation3], 1 }
 0x4ac   :  { %1856 = vsyncpa [#allocation3 + $0x1], 1 }
 0x4ad   :  { %1857 = vsyncpa [#allocation5], 1 }
 0x4ae   :  { %1859 = vsyncpa [#allocation5 + $0x1], 1 }

</bundles_post_ra>
